<compile_context>
chip_gen: v6e
topology: v6e:2x2x1
jax: 0.10.0
libtpu: 0.0.40
codegen_flags: <defaults>
</compile_context>

<pallas_src>
import functools

import jax
import jax.numpy as jnp
from jax import lax
from jax.experimental import pallas as pl
from jax.experimental.pallas import tpu as pltpu


def _triplet_loss_kernel(emb_row_ref, emb_col_ref, lab_row_ref, lab_col_ref,
                         sq_row_ref, half_sq_col_ref,
                         loss_ref, max_acc, min_acc, *, margin: float):
    i = pl.program_id(0)
    j = pl.program_id(1)
    n_col = pl.num_programs(1)
    neg_inf = jnp.float32(-jnp.inf)
    pos_inf = jnp.float32(jnp.inf)

    @pl.when(j == 0)
    def _():
        max_acc[...] = jnp.full_like(max_acc, neg_inf)
        min_acc[...] = jnp.full_like(min_acc, pos_inf)

    xr = emb_row_ref[...]                         # (tm, D) native dtype, resident
    xc = emb_col_ref[...]                         # (tn, D) native dtype, streamed
    tm = xr.shape[0]
    tn = xc.shape[0]

    # Gram block on the MXU: contract the feature dim of both operands (no
    # materialized transpose), f32 accumulation.
    gram = lax.dot_general(
        xr, xc,
        dimension_numbers=(((1,), (1,)), ((), ())),
        preferred_element_type=jnp.float32)       # (tm, tn)

    # Half-squared distance minus the row-constant ||x_i||^2/2 term (hoisted
    # to finalize):  part[i,j] = ||x_j||^2/2 - <x_i, x_j>.
    # Column norms are precomputed in the wrapper (padded columns carry +inf,
    # so they can never win either reduction below).
    part = half_sq_col_ref[...] - gram            # (tm, tn), (1,tn) broadcast

    same = lab_row_ref[...] == lab_col_ref[...]   # (tm, tn) bool

    # Hardest negative: running min over different-label candidates.
    min_acc[...] = jnp.minimum(
        min_acc[...],
        jnp.min(jnp.where(same, pos_inf, part), axis=1, keepdims=True))

    # Hardest positive: running max over same-label candidates, excluding the
    # self pair.  The self-pair exclusion (iotas + int compare + AND) only
    # runs on grid steps whose row/column tiles actually overlap.
    row_lo = i * tm
    col_lo = j * tn
    overlaps = jnp.logical_and(row_lo < col_lo + tn, col_lo < row_lo + tm)

    @pl.when(overlaps)
    def _():
        row_g = row_lo + lax.broadcasted_iota(jnp.int32, (tm, tn), 0)
        col_g = col_lo + lax.broadcasted_iota(jnp.int32, (tm, tn), 1)
        pos_mask = jnp.logical_and(same, row_g != col_g)
        max_acc[...] = jnp.maximum(
            max_acc[...],
            jnp.max(jnp.where(pos_mask, part, neg_inf), axis=1, keepdims=True))

    @pl.when(jnp.logical_not(overlaps))
    def _():
        max_acc[...] = jnp.maximum(
            max_acc[...],
            jnp.max(jnp.where(same, part, neg_inf), axis=1, keepdims=True))

    @pl.when(j == n_col - 1)
    def _():
        sq_row = sq_row_ref[...]                  # (tm, 1) f32, precomputed
        hp_half = max_acc[...]
        hn_half = min_acc[...]
        hp_sq = 2.0 * hp_half + sq_row            # undo the 1/2 folding
        hn_sq = 2.0 * hn_half + sq_row
        # Anchors with no valid positive keep the -inf sentinel (matches the
        # PyTorch reference, where relu(-inf - x + m) collapses to 0); no
        # valid negative -> +inf sentinel -> relu(x - inf + m) -> 0.
        hardest_positive = jnp.where(
            hp_half > neg_inf,
            jnp.sqrt(jnp.maximum(hp_sq, 0.0)),
            neg_inf)
        hardest_negative = jnp.sqrt(jnp.maximum(hn_sq, 0.0))
        # NOTE: a lane-dense (1, tm) output layout was evaluated, but the
        # required (tm,1)->(1,tm) relayout at finalize is not worth the risk
        # for a tiny (B,1) output.
        loss_ref[...] = jnp.maximum(
            hardest_positive - hardest_negative + jnp.float32(margin), 0.0)


def _round_up(x: int, m: int) -> int:
    return ((x + m - 1) // m) * m


def _vmem_budget_bytes() -> int:
    """Per-generation VMEM budget (bytes), with headroom for compiler scratch."""
    cap = 64 << 20  # conservative default = v7x per-TensorCore VMEM
    try:
        cap = int(getattr(pltpu.get_tpu_info(), "vmem_capacity_bytes", cap))
    except Exception:
        pass
    return cap * 3 // 4  # ~48 MiB on v7x, ~96 MiB on v5e / v6e


def _tile_cost_bytes(tm: int, tn: int, d: int, itemsize: int) -> int:
    # Double-buffered embedding blocks + (tm,tn) f32 temporaries (gram / part /
    # mask / where results) + the small per-row vectors and accumulators.
    return (2 * (tm + tn) * d * itemsize
            + 6 * tm * tn * 4
            + 8 * (tm + tn) * 4)


def _pick_tiles(B: int, d_pad: int, itemsize: int, budget: int):
    """MXU-aligned (tm, tn, B_pad) under an explicit VMEM budget.

    tm is the roofline lever (streamed-column HBM traffic ~ B^2*D*bytes/tm) and
    is grown as far as the budget allows while keeping >= 2 row blocks so the
    "parallel" row axis can feed both v7x TensorCores / megacore.
    """
    base = 128 if B <= 128 else 256          # 256 = v6e/v7x MXU tile; 128 ok on v5e
    b_pad = _round_up(B, base)

    # Column tile: prefer a full 256-wide MXU tile when it divides the batch.
    tn = 256 if (b_pad % 256 == 0
                 and _tile_cost_bytes(128, 256, d_pad, itemsize) <= budget) else 128

    # Row tile: largest aligned divisor of b_pad that fits the budget and
    # still leaves >= 2 row blocks.
    tm = 128
    for cand in (256, 512, 1024):
        if (cand <= b_pad and b_pad % cand == 0 and b_pad // cand >= 2
                and _tile_cost_bytes(cand, tn, d_pad, itemsize) <= budget):
            tm = cand
    # Very large D: shrink the column tile before giving up on the budget.
    # TODO(synk): for D >= ~8K add an innermost feature-chunk grid axis that
    # accumulates the Gram into a (tm, tn) f32 scratch so large row tiles are
    # preserved at any D.
    while _tile_cost_bytes(tm, tn, d_pad, itemsize) > budget and tn > 128:
        tn //= 2
    return tm, tn, b_pad


def triplet_loss(embeddings: jax.Array, labels: jax.Array,
                 margin: float = 0.3) -> jax.Array:
    """Pallas implementation of TripletLoss.forward (batch-hard mining).

    embeddings: (B, D) float array (kept in its native dtype, e.g. bf16/f32)
    labels:     (B,)   integer identity labels
    returns:    scalar f32 mean triplet loss
    """
    B, D = embeddings.shape
    itemsize = jnp.dtype(embeddings.dtype).itemsize
    d_pad = _round_up(D, 128)                    # lane-aligned feature dim
    budget = _vmem_budget_bytes()
    tm, tn, b_pad = _pick_tiles(B, d_pad, itemsize, budget)

    # Zero-pad features (changes neither Gram nor norms) and batch rows.
    x = embeddings
    if b_pad != B or d_pad != D:
        x = jnp.pad(embeddings, ((0, b_pad - B), (0, d_pad - D)))

    labels32 = labels.astype(jnp.int32)
    if b_pad != B:
        # Padded rows get a label no real row can match, so they never form
        # positives; their +inf column norms (below) keep them out of the
        # negative min as well.  Padded anchor rows are sliced off the mean.
        sentinel = jnp.max(labels32) + 1
        labels32 = jnp.concatenate(
            [labels32, jnp.full((b_pad - B,), sentinel, dtype=jnp.int32)])
    labels_row = labels32.reshape(b_pad, 1)
    labels_col = labels32.reshape(1, b_pad)

    # Precompute squared norms once (f32); the column copy carries the folded
    # factor 1/2 and +inf on padded columns.
    x32 = x.astype(jnp.float32)
    sq = jnp.sum(x32 * x32, axis=1)                                  # (b_pad,)
    sq_row = sq.reshape(b_pad, 1)
    col_valid = jnp.arange(b_pad) < B
    half_sq_col = jnp.where(col_valid, 0.5 * sq, jnp.inf).reshape(1, b_pad)

    grid = (b_pad // tm, b_pad // tn)

    per_anchor = pl.pallas_call(
        functools.partial(_triplet_loss_kernel, margin=float(margin)),
        out_shape=jax.ShapeDtypeStruct((b_pad, 1), jnp.float32),
        grid_spec=pltpu.PrefetchScalarGridSpec(
            num_scalar_prefetch=0,
            grid=grid,
            in_specs=[
                pl.BlockSpec((tm, d_pad), lambda i, j: (i, 0)),  # anchor rows
                pl.BlockSpec((tn, d_pad), lambda i, j: (j, 0)),  # candidate cols
                pl.BlockSpec((tm, 1), lambda i, j: (i, 0)),      # row labels
                pl.BlockSpec((1, tn), lambda i, j: (0, j)),      # col labels
                pl.BlockSpec((tm, 1), lambda i, j: (i, 0)),      # ||x_i||^2
                pl.BlockSpec((1, tn), lambda i, j: (0, j)),      # ||x_j||^2 / 2
            ],
            out_specs=pl.BlockSpec((tm, 1), lambda i, j: (i, 0)),
            scratch_shapes=[
                pltpu.VMEM((tm, 1), jnp.float32),  # running max (hard positive)
                pltpu.VMEM((tm, 1), jnp.float32),  # running min (hard negative)
            ],
        ),
        compiler_params=pltpu.CompilerParams(
            dimension_semantics=("parallel", "arbitrary"),
            vmem_limit_bytes=int(budget)),
    )(x, x, labels_row, labels_col, sq_row, half_sq_col)

    # Tiny O(B) reduction kept in JAX; padded anchors are sliced off first.
    return jnp.mean(per_anchor[:B, 0])


def _triplet_loss_ref(embeddings: jax.Array, labels: jax.Array,
                      margin: float = 0.3) -> jax.Array:
    """Pure-JAX reference mirroring the PyTorch module."""
    x = embeddings.astype(jnp.float32)
    sq = jnp.sum(x * x, axis=1, keepdims=True)
    dist_sq = jnp.maximum(sq + sq.T - 2.0 * (x @ x.T), 0.0)
    dist = jnp.sqrt(dist_sq)
    eq = labels[None, :] == labels[:, None]
    diag = jnp.eye(x.shape[0], dtype=bool)
    pos = jnp.where(eq & ~diag, dist, -jnp.inf)
    neg = jnp.where(~eq, dist, jnp.inf)
    hp = jnp.max(pos, axis=1)
    hn = jnp.min(neg, axis=1)
    return jnp.mean(jnp.maximum(hp - hn + margin, 0.0))


if __name__ == "__main__":
    key = jax.random.PRNGKey(0)
    # Small toy shapes (wrapper pads B and D to tile granularity internally).
    B, D = 8, 32
    embeddings = jax.random.normal(key, (B, D), dtype=jnp.float32)
    # 4 identities, 2 samples each: every anchor has a positive and a negative.
    labels = jnp.array([0, 0, 1, 1, 2, 2, 3, 3], dtype=jnp.int32)

    loss = triplet_loss(embeddings, labels, margin=0.3)
    jax.block_until_ready(loss)

    ref = _triplet_loss_ref(embeddings, labels, margin=0.3)
    assert jnp.allclose(loss, ref, atol=1e-4, rtol=1e-4), (loss, ref)
    print("KERNEL_OK")
</pallas_src>

<mosaic_0001>
module attributes {stable_mosaic.version = 11 : i64} {
  func.func @_triplet_loss_kernel(%arg0: i32, %arg1: i32, %arg2: memref<128x128xf32, #tpu.memory_space<vmem>>, %arg3: memref<128x128xf32, #tpu.memory_space<vmem>>, %arg4: memref<128x1xi32, #tpu.memory_space<vmem>>, %arg5: memref<1x128xi32, #tpu.memory_space<vmem>>, %arg6: memref<128x1xf32, #tpu.memory_space<vmem>>, %arg7: memref<1x128xf32, #tpu.memory_space<vmem>>, %arg8: memref<128x1xf32, #tpu.memory_space<vmem>>, %arg9: memref<128x1xf32, #tpu.memory_space<vmem>>, %arg10: memref<128x1xf32, #tpu.memory_space<vmem>>) attributes {dimension_semantics = [#tpu.dimension_semantics<parallel>, #tpu.dimension_semantics<arbitrary>], iteration_bounds = array<i64: 1, 1>, scalar_prefetch = 0 : i64, scratch_operands = 2 : i64, tpu.core_type = #tpu.core_type<tc>, window_params = [{transform_indices = @transform_0, window_bounds = array<i64: 128, 128>}, {transform_indices = @transform_1, window_bounds = array<i64: 128, 128>}, {transform_indices = @transform_2, window_bounds = array<i64: 128, 1>}, {transform_indices = @transform_3, window_bounds = array<i64: 1, 128>}, {transform_indices = @transform_4, window_bounds = array<i64: 128, 1>}, {transform_indices = @transform_5, window_bounds = array<i64: 1, 128>}, {transform_indices = @transform_6, window_bounds = array<i64: 128, 1>}]} {
    %c0_i32 = arith.constant 0 : i32
    %0 = arith.cmpi eq, %arg1, %c0_i32 : i32
    %1 = arith.extui %0 : i1 to i32
    %cst = arith.constant 0xFF800000 : f32
    %cst_0 = arith.constant 0x7F800000 : f32
    %c0_i32_1 = arith.constant 0 : i32
    %2 = arith.cmpi ne, %1, %c0_i32_1 : i32
    scf.if %2 {
      %36 = vector.broadcast %cst : f32 to vector<128x1xf32>
      %c0_28 = arith.constant 0 : index
      %c0_29 = arith.constant 0 : index
      %37 = vector.load %arg9[%c0_28, %c0_29] : memref<128x1xf32, #tpu.memory_space<vmem>>, vector<128x1xf32>
      tpu.vector_store %arg9[%c0_28, %c0_29], %36 {strides = array<i32>} : memref<128x1xf32, #tpu.memory_space<vmem>>, vector<128x1xf32>,
      %38 = vector.broadcast %cst_0 : f32 to vector<128x1xf32>
      %c0_30 = arith.constant 0 : index
      %c0_31 = arith.constant 0 : index
      %39 = vector.load %arg10[%c0_30, %c0_31] : memref<128x1xf32, #tpu.memory_space<vmem>>, vector<128x1xf32>
      tpu.vector_store %arg10[%c0_30, %c0_31], %38 {strides = array<i32>} : memref<128x1xf32, #tpu.memory_space<vmem>>, vector<128x1xf32>,
    } else {
    }
    %c0 = arith.constant 0 : index
    %c0_2 = arith.constant 0 : index
    %3 = vector.load %arg2[%c0, %c0_2] : memref<128x128xf32, #tpu.memory_space<vmem>>, vector<128x128xf32>
    %c0_3 = arith.constant 0 : index
    %c0_4 = arith.constant 0 : index
    %4 = vector.load %arg3[%c0_3, %c0_4] : memref<128x128xf32, #tpu.memory_space<vmem>>, vector<128x128xf32>
    %cst_5 = arith.constant dense<0.000000e+00> : vector<128x128xf32>
    %5 = tpu.matmul %3, %4, %cst_5 {dimension_numbers = #tpu.dot_dimension_numbers<[1], [1], [0], [0], [0, 0, 1, 0], [], []>} : vector<128x128xf32>, vector<128x128xf32>, vector<128x128xf32> -> vector<128x128xf32>
    %c0_6 = arith.constant 0 : index
    %c0_7 = arith.constant 0 : index
    %6 = vector.load %arg7[%c0_6, %c0_7] : memref<1x128xf32, #tpu.memory_space<vmem>>, vector<1x128xf32>
    %7 = vector.broadcast %6 : vector<1x128xf32> to vector<128x128xf32>
    %8 = arith.subf %7, %5 : vector<128x128xf32>
    %c0_8 = arith.constant 0 : index
    %c0_9 = arith.constant 0 : index
    %9 = vector.load %arg4[%c0_8, %c0_9] : memref<128x1xi32, #tpu.memory_space<vmem>>, vector<128x1xi32>
    %c0_10 = arith.constant 0 : index
    %c0_11 = arith.constant 0 : index
    %10 = vector.load %arg5[%c0_10, %c0_11] : memref<1x128xi32, #tpu.memory_space<vmem>>, vector<1x128xi32>
    %11 = vector.broadcast %9 : vector<128x1xi32> to vector<128x128xi32>
    %12 = vector.broadcast %10 : vector<1x128xi32> to vector<128x128xi32>
    %13 = arith.cmpi eq, %11, %12 : vector<128x128xi32>
    %c0_12 = arith.constant 0 : index
    %c0_13 = arith.constant 0 : index
    %14 = vector.load %arg10[%c0_12, %c0_13] : memref<128x1xf32, #tpu.memory_space<vmem>>, vector<128x1xf32>
    %cst_14 = arith.constant 0x7F800000 : f32
    %15 = vector.broadcast %cst_14 : f32 to vector<128x128xf32>
    %16 = arith.select %13, %15, %8 : vector<128x128xi1>, vector<128x128xf32>
    %cst_15 = arith.constant dense<0x7F800000> : vector<128xf32>
    %17 = vector.multi_reduction <minimumf>, %16, %cst_15 [1] : vector<128x128xf32> to vector<128xf32>
    %18 = vector.shape_cast %17 : vector<128xf32> to vector<128x1xf32>
    %19 = arith.minimumf %14, %18 : vector<128x1xf32>
    %c0_16 = arith.constant 0 : index
    %c0_17 = arith.constant 0 : index
    %20 = vector.load %arg10[%c0_16, %c0_17] : memref<128x1xf32, #tpu.memory_space<vmem>>, vector<128x1xf32>
    tpu.vector_store %arg10[%c0_16, %c0_17], %19 {strides = array<i32>} : memref<128x1xf32, #tpu.memory_space<vmem>>, vector<128x1xf32>,
    %c128_i32 = arith.constant 128 : i32
    %21 = arith.muli %arg0, %c128_i32 : i32
    %c128_i32_18 = arith.constant 128 : i32
    %22 = arith.muli %arg1, %c128_i32_18 : i32
    %c128_i32_19 = arith.constant 128 : i32
    %23 = arith.addi %22, %c128_i32_19 : i32
    %24 = arith.cmpi slt, %21, %23 : i32
    %c128_i32_20 = arith.constant 128 : i32
    %25 = arith.addi %21, %c128_i32_20 : i32
    %26 = arith.cmpi slt, %22, %25 : i32
    %27 = arith.andi %24, %26 : i1
    %28 = arith.extui %27 : i1 to i32
    %cst_21 = arith.constant 0xFF800000 : f32
    %c0_i32_22 = arith.constant 0 : i32
    %29 = arith.cmpi ne, %28, %c0_i32_22 : i32
    scf.if %29 {
      %36 = tpu.iota {dimensions = array<i32: 0>} : vector<128x128xi32>
      %37 = vector.broadcast %21 : i32 to vector<128x128xi32>
      %38 = arith.addi %37, %36 : vector<128x128xi32>
      %39 = tpu.iota {dimensions = array<i32: 1>} : vector<128x128xi32>
      %40 = vector.broadcast %22 : i32 to vector<128x128xi32>
      %41 = arith.addi %40, %39 : vector<128x128xi32>
      %42 = arith.cmpi ne, %38, %41 : vector<128x128xi32>
      %43 = arith.andi %13, %42 : vector<128x128xi1>
      %c0_28 = arith.constant 0 : index
      %c0_29 = arith.constant 0 : index
      %44 = vector.load %arg9[%c0_28, %c0_29] : memref<128x1xf32, #tpu.memory_space<vmem>>, vector<128x1xf32>
      %45 = vector.broadcast %cst_21 : f32 to vector<128x128xf32>
      %46 = arith.select %43, %8, %45 : vector<128x128xi1>, vector<128x128xf32>
      %cst_30 = arith.constant dense<0xFF800000> : vector<128xf32>
      %47 = vector.multi_reduction <maximumf>, %46, %cst_30 [1] : vector<128x128xf32> to vector<128xf32>
      %48 = vector.shape_cast %47 : vector<128xf32> to vector<128x1xf32>
      %49 = arith.maximumf %44, %48 : vector<128x1xf32>
      %c0_31 = arith.constant 0 : index
      %c0_32 = arith.constant 0 : index
      %50 = vector.load %arg9[%c0_31, %c0_32] : memref<128x1xf32, #tpu.memory_space<vmem>>, vector<128x1xf32>
      tpu.vector_store %arg9[%c0_31, %c0_32], %49 {strides = array<i32>} : memref<128x1xf32, #tpu.memory_space<vmem>>, vector<128x1xf32>,
    } else {
    }
    %true = arith.constant true
    %30 = arith.xori %27, %true : i1
    %31 = arith.extui %30 : i1 to i32
    %cst_23 = arith.constant 0xFF800000 : f32
    %c0_i32_24 = arith.constant 0 : i32
    %32 = arith.cmpi ne, %31, %c0_i32_24 : i32
    scf.if %32 {
      %c0_28 = arith.constant 0 : index
      %c0_29 = arith.constant 0 : index
      %36 = vector.load %arg9[%c0_28, %c0_29] : memref<128x1xf32, #tpu.memory_space<vmem>>, vector<128x1xf32>
      %37 = vector.broadcast %cst_23 : f32 to vector<128x128xf32>
      %38 = arith.select %13, %8, %37 : vector<128x128xi1>, vector<128x128xf32>
      %cst_30 = arith.constant dense<0xFF800000> : vector<128xf32>
      %39 = vector.multi_reduction <maximumf>, %38, %cst_30 [1] : vector<128x128xf32> to vector<128xf32>
      %40 = vector.shape_cast %39 : vector<128xf32> to vector<128x1xf32>
      %41 = arith.maximumf %36, %40 : vector<128x1xf32>
      %c0_31 = arith.constant 0 : index
      %c0_32 = arith.constant 0 : index
      %42 = vector.load %arg9[%c0_31, %c0_32] : memref<128x1xf32, #tpu.memory_space<vmem>>, vector<128x1xf32>
      tpu.vector_store %arg9[%c0_31, %c0_32], %41 {strides = array<i32>} : memref<128x1xf32, #tpu.memory_space<vmem>>, vector<128x1xf32>,
    } else {
    }
    %c0_i32_25 = arith.constant 0 : i32
    %33 = arith.cmpi eq, %arg1, %c0_i32_25 : i32
    %34 = arith.extui %33 : i1 to i32
    %cst_26 = arith.constant 0xFF800000 : f32
    %c0_i32_27 = arith.constant 0 : i32
    %35 = arith.cmpi ne, %34, %c0_i32_27 : i32
    scf.if %35 {
      %c0_28 = arith.constant 0 : index
      %c0_29 = arith.constant 0 : index
      %36 = vector.load %arg6[%c0_28, %c0_29] : memref<128x1xf32, #tpu.memory_space<vmem>>, vector<128x1xf32>
      %c0_30 = arith.constant 0 : index
      %c0_31 = arith.constant 0 : index
      %37 = vector.load %arg9[%c0_30, %c0_31] : memref<128x1xf32, #tpu.memory_space<vmem>>, vector<128x1xf32>
      %c0_32 = arith.constant 0 : index
      %c0_33 = arith.constant 0 : index
      %38 = vector.load %arg10[%c0_32, %c0_33] : memref<128x1xf32, #tpu.memory_space<vmem>>, vector<128x1xf32>
      %cst_34 = arith.constant 2.000000e+00 : f32
      %39 = vector.broadcast %cst_34 : f32 to vector<128x1xf32>
      %40 = arith.mulf %39, %37 : vector<128x1xf32>
      %41 = arith.addf %40, %36 : vector<128x1xf32>
      %cst_35 = arith.constant 2.000000e+00 : f32
      %42 = vector.broadcast %cst_35 : f32 to vector<128x1xf32>
      %43 = arith.mulf %42, %38 : vector<128x1xf32>
      %44 = arith.addf %43, %36 : vector<128x1xf32>
      %45 = vector.broadcast %cst_26 : f32 to vector<128x1xf32>
      %46 = arith.cmpf ogt, %37, %45 : vector<128x1xf32>
      %cst_36 = arith.constant 0.000000e+00 : f32
      %47 = vector.broadcast %cst_36 : f32 to vector<128x1xf32>
      %48 = arith.maximumf %41, %47 : vector<128x1xf32>
      %49 = math.sqrt %48 : vector<128x1xf32>
      %50 = vector.broadcast %cst_26 : f32 to vector<128x1xf32>
      %51 = arith.select %46, %49, %50 : vector<128x1xi1>, vector<128x1xf32>
      %cst_37 = arith.constant 0.000000e+00 : f32
      %52 = vector.broadcast %cst_37 : f32 to vector<128x1xf32>
      %53 = arith.maximumf %44, %52 : vector<128x1xf32>
      %54 = math.sqrt %53 : vector<128x1xf32>
      %55 = arith.subf %51, %54 : vector<128x1xf32>
      %cst_38 = arith.constant 3.000000e-01 : f32
      %56 = vector.broadcast %cst_38 : f32 to vector<128x1xf32>
      %57 = arith.addf %55, %56 : vector<128x1xf32>
      %cst_39 = arith.constant 0.000000e+00 : f32
      %58 = vector.broadcast %cst_39 : f32 to vector<128x1xf32>
      %59 = arith.maximumf %57, %58 : vector<128x1xf32>
      %c0_40 = arith.constant 0 : index
      %c0_41 = arith.constant 0 : index
      %60 = vector.load %arg8[%c0_40, %c0_41] : memref<128x1xf32, #tpu.memory_space<vmem>>, vector<128x1xf32>
      tpu.vector_store %arg8[%c0_40, %c0_41], %59 {strides = array<i32>} : memref<128x1xf32, #tpu.memory_space<vmem>>, vector<128x1xf32>,
    } else {
    }
    return
  }
  func.func @transform_0(%arg0: i32, %arg1: i32) -> (i32, i32) {
    %c0_i32 = arith.constant 0 : i32
    %c0_i32_0 = arith.constant 0 : i32
    return %arg0, %c0_i32 : i32, i32
  }
  func.func @transform_1(%arg0: i32, %arg1: i32) -> (i32, i32) {
    %c0_i32 = arith.constant 0 : i32
    %c0_i32_0 = arith.constant 0 : i32
    return %arg1, %c0_i32 : i32, i32
  }
  func.func @transform_2(%arg0: i32, %arg1: i32) -> (i32, i32) {
    %c0_i32 = arith.constant 0 : i32
    %c0_i32_0 = arith.constant 0 : i32
    return %arg0, %c0_i32 : i32, i32
  }
  func.func @transform_3(%arg0: i32, %arg1: i32) -> (i32, i32) {
    %c0_i32 = arith.constant 0 : i32
    %c0_i32_0 = arith.constant 0 : i32
    return %c0_i32, %arg1 : i32, i32
  }
  func.func @transform_4(%arg0: i32, %arg1: i32) -> (i32, i32) {
    %c0_i32 = arith.constant 0 : i32
    %c0_i32_0 = arith.constant 0 : i32
    return %arg0, %c0_i32 : i32, i32
  }
  func.func @transform_5(%arg0: i32, %arg1: i32) -> (i32, i32) {
    %c0_i32 = arith.constant 0 : i32
    %c0_i32_0 = arith.constant 0 : i32
    return %c0_i32, %arg1 : i32, i32
  }
  func.func @transform_6(%arg0: i32, %arg1: i32) -> (i32, i32) {
    %c0_i32 = arith.constant 0 : i32
    %c0_i32_0 = arith.constant 0 : i32
    return %arg0, %c0_i32 : i32, i32
  }
}

</mosaic_0001>

<bundles_post_ra>
// kernel: tpu_custom_call.1
= control target key start
LH: loop header
LB: loop body
LE: loop exit
PB: predicated region body
PF: predicated region fallthrough
CT: control target
= control target key end

     0   :  { %v1379_v2 = vmov 0   ;;  %vm27_vm0 = vcmask 7168   ;;  %v1380_v49 = vmov -inf   ;;  %v452_v55 = vlaneseq  ;;  %s2397_s1 = inlined_call_operand.vmem [shape: f32[128,128], index: 1, kind: input, shape index: {}]   ;;  %s2398_s0 = inlined_call_operand.vmem [shape: f32[128,128], index: 0, kind: input, shape index: {}]   ;;  %s2399_s2 = inlined_call_operand.vmem [shape: s32[128,1], index: 2, kind: input, shape index: {}]   ;;  %s2400_s3 = inlined_call_operand.vmem [shape: s32[1,128], index: 3, kind: input, shape index: {}]   ;;  %s2401_s5 = inlined_call_operand.vmem [shape: f32[1,128], index: 5, kind: input, shape index: {}]   ;;  %s2402_s4 = inlined_call_operand.vmem [shape: f32[128,1], index: 4, kind: input, shape index: {}]   ;;  %s2403_s6 = inlined_call_operand.vmem [shape: f32[128,1], index: 6, kind: output, shape index: {}]  }
   0x1   :  { %v91_v0 = vld [vmem:[%s2397_s1 + $0x78] sm:$0xff]  ;;  %v90_v1 = vld [vmem:[%s2397_s1 + $0x70] sm:$0xff]  ;;  %1314 = vset.pattern.permute.xlu1 %v1379_v2  ;;  %1313 = vset.pattern.permute.xlu0 %v1379_v2  ;;  %v89_v3 = vld [vmem:[%s2397_s1 + $0x68] sm:$0xff]  ;;  %37 = vst.msk [vmem:[#allocation2 + $0x48] sm:$0xff] %vm27_vm0, %v1380_v49 }
   0x2   :  { %1222 = vmatprep.subr.mxu0 %v91_v0  ;;  %1278 = vmatprep.subr.mxu1 %v91_v0  ;;  %v60_v4 = vld [vmem:[%s2398_s0] sm:$0xff]  ;;  %v262_v7 = vld [vmem:[%s2399_s2 + $0x10] sm:$0xff]  ;;  %v87_v8 = vld [vmem:[%s2397_s1 + $0x58] sm:$0xff]  ;;  %28 = vst.msk [vmem:[#allocation2] sm:$0xff] %vm27_vm0, %v1380_v49  ;;  %v1587_v57 = vshrl.u32 %v452_v55, 7  ;;  %v1593_v61 = vand.u32 127, %v452_v55 }
   0x3   :  { %1223 = vmatpush3.xpose.msra.mxu0 %v91_v0  ;;  %1294 = vmatpush3.xpose.msra.mxu1 %v91_v0  ;;  %v68_v5 = vld [vmem:[%s2398_s0 + $0x40] sm:$0xff]  ;;  %v263_v10 = vld [vmem:[%s2399_s2 + $0x18] sm:$0xff]  ;;  %v261_v11 = vld [vmem:[%s2399_s2 + $0x8] sm:$0xff]  ;;  %29 = vst.msk [vmem:[#allocation2 + $0x8] sm:$0xff] %vm27_vm0, %v1380_v49 }
   0x4   :  { %1224 = vmatprep.subr.mxu0 %v90_v1  ;;  %1279 = vmatprep.subr.mxu1 %v90_v1  ;;  %v88_v6 = vld [vmem:[%s2397_s1 + $0x60] sm:$0xff]  ;;  %v86_v12 = vld [vmem:[%s2397_s1 + $0x50] sm:$0xff]  ;;  %v265_v13 = vld [vmem:[%s2399_s2 + $0x28] sm:$0xff]  ;;  %30 = vst.msk [vmem:[#allocation2 + $0x10] sm:$0xff] %vm27_vm0, %v1380_v49  ;;  %v454_v59 = vadd.s32 8, %v1587_v57  ;;  %v462_v60 = vadd.s32 72, %v1587_v57  ;;  %vm490_vm11 = vcmp.ne.s32.totalorder %v1587_v57, %v1593_v61 }
   0x5   :  { %1254 = vmatprep.mubr.f32.mxu0 %v60_v4  ;;  %1266 = vmatprep.mubr.f32.mxu1 %v68_v5  ;;  %v260_v9 = vld [vmem:[%s2399_s2] sm:$0xff]  ;;  %v85_v15 = vld [vmem:[%s2397_s1 + $0x48] sm:$0xff]  ;;  %v267_v16 = vld [vmem:[%s2399_s2 + $0x38] sm:$0xff]  ;;  %31 = vst.msk [vmem:[#allocation2 + $0x18] sm:$0xff] %vm27_vm0, %v1380_v49  ;;  %v461_v2 = vadd.s32 64, %v1587_v57  ;;  %v466_v55 = vadd.s32 104, %v1587_v57 }
   0x6   :  { %284 = vperm.xlu1 %1314, %v262_v7   ;;  %278 = vperm.xlu0 %1313, %v260_v9   ;;  %v264_v14 = vld [vmem:[%s2399_s2 + $0x20] sm:$0xff]  ;;  %v266_v17 = vld [vmem:[%s2399_s2 + $0x30] sm:$0xff]  ;;  %v269_v19 = vld [vmem:[%s2399_s2 + $0x48] sm:$0xff]  ;;  %32 = vst.msk [vmem:[#allocation2 + $0x20] sm:$0xff] %vm27_vm0, %v1380_v49  ;;  %vm491_vm2 = vcmp.ne.s32.totalorder %v454_v59, %v1593_v61  ;;  %vm499_vm4 = vcmp.ne.s32.totalorder %v462_v60, %v1593_v61 }
   0x7   :  { %1225 = vmatpush3.xpose.msra.mxu0 %v90_v1  ;;  %1295 = vmatpush3.xpose.msra.mxu1 %v90_v1  ;;  %v84_v18 = vld [vmem:[%s2397_s1 + $0x40] sm:$0xff]  ;;  %v83_v21 = vld [vmem:[%s2397_s1 + $0x38] sm:$0xff]  ;;  %v270_v23 = vld [vmem:[%s2399_s2 + $0x50] sm:$0xff]  ;;  %33 = vst.msk [vmem:[#allocation2 + $0x28] sm:$0xff] %vm27_vm0, %v1380_v49  ;;  %vm498_vm7 = vcmp.ne.s32.totalorder %v461_v2, %v1593_v61 }
   0x8   :  { %1226 = vmatprep.subr.mxu0 %v89_v3  ;;  %1280 = vmatprep.subr.mxu1 %v89_v3  ;;  %v268_v20 = vld [vmem:[%s2399_s2 + $0x40] sm:$0xff]  ;;  %v271_v22 = vld [vmem:[%s2399_s2 + $0x58] sm:$0xff]  ;;  %v82_v24 = vld [vmem:[%s2397_s1 + $0x30] sm:$0xff]  ;;  %34 = vst.msk [vmem:[#allocation2 + $0x30] sm:$0xff] %vm27_vm0, %v1380_v49 }
   0x9   :  { %v273_v25 = vld [vmem:[%s2399_s2 + $0x68] sm:$0xff]  ;;  %v272_v26 = vld [vmem:[%s2399_s2 + $0x60] sm:$0xff]  ;;  %v275_v28 = vld [vmem:[%s2399_s2 + $0x78] sm:$0xff]  ;;  %35 = vst.msk [vmem:[#allocation2 + $0x38] sm:$0xff] %vm27_vm0, %v1380_v49 }
   0xa   :  { %287 = vperm.xlu1 %1314, %v263_v10   ;;  %281 = vperm.xlu0 %1313, %v261_v11   ;;  %v81_v27 = vld [vmem:[%s2397_s1 + $0x28] sm:$0xff]  ;;  %v274_v29 = vld [vmem:[%s2399_s2 + $0x70] sm:$0xff]  ;;  %v80_v30 = vld [vmem:[%s2397_s1 + $0x20] sm:$0xff]  ;;  %36 = vst.msk [vmem:[#allocation2 + $0x40] sm:$0xff] %vm27_vm0, %v1380_v49 }
   0xb   :  { %1227 = vmatpush3.xpose.msra.mxu0 %v89_v3  ;;  %1296 = vmatpush3.xpose.msra.mxu1 %v89_v3  ;;  %v79_v31 = vld [vmem:[%s2397_s1 + $0x18] sm:$0xff]  ;;  %v78_v32 = vld [vmem:[%s2397_s1 + $0x10] sm:$0xff]  ;;  %v77_v33 = vld [vmem:[%s2397_s1 + $0x8] sm:$0xff]  ;;  %38 = vst.msk [vmem:[#allocation2 + $0x50] sm:$0xff] %vm27_vm0, %v1380_v49 }
   0xc   :  { %1228 = vmatprep.subr.mxu0 %v88_v6  ;;  %1281 = vmatprep.subr.mxu1 %v88_v6  ;;  %v76_v34 = vld [vmem:[%s2397_s1] sm:$0xff]  ;;  %v61_v35 = vld [vmem:[%s2398_s0 + $0x8] sm:$0xff]  ;;  %v62_v37 = vld [vmem:[%s2398_s0 + $0x10] sm:$0xff]  ;;  %39 = vst.msk [vmem:[#allocation2 + $0x58] sm:$0xff] %vm27_vm0, %v1380_v49 }
   0xd   :  { %v69_v36 = vld [vmem:[%s2398_s0 + $0x48] sm:$0xff]  ;;  %v70_v38 = vld [vmem:[%s2398_s0 + $0x50] sm:$0xff]  ;;  %v63_v39 = vld [vmem:[%s2398_s0 + $0x18] sm:$0xff]  ;;  %40 = vst.msk [vmem:[#allocation2 + $0x60] sm:$0xff] %vm27_vm0, %v1380_v49 }
   0xe   :  { %293 = vperm.xlu1 %1314, %v265_v13   ;;  %290 = vperm.xlu0 %1313, %v264_v14   ;;  %v71_v40 = vld [vmem:[%s2398_s0 + $0x58] sm:$0xff]  ;;  %v64_v41 = vld [vmem:[%s2398_s0 + $0x20] sm:$0xff]  ;;  %v65_v43 = vld [vmem:[%s2398_s0 + $0x28] sm:$0xff]  ;;  %41 = vst.msk [vmem:[#allocation2 + $0x68] sm:$0xff] %vm27_vm0, %v1380_v49 }
   0xf   :  { %1229 = vmatpush3.xpose.msra.mxu0 %v88_v6  ;;  %1297 = vmatpush3.xpose.msra.mxu1 %v88_v6  ;;  %v72_v42 = vld [vmem:[%s2398_s0 + $0x60] sm:$0xff]  ;;  %v73_v44 = vld [vmem:[%s2398_s0 + $0x68] sm:$0xff]  ;;  %v66_v45 = vld [vmem:[%s2398_s0 + $0x30] sm:$0xff]  ;;  %42 = vst.msk [vmem:[#allocation2 + $0x70] sm:$0xff] %vm27_vm0, %v1380_v49 }
  0x10   :  { %1230 = vmatprep.subr.mxu0 %v87_v8  ;;  %1282 = vmatprep.subr.mxu1 %v87_v8  ;;  %v74_v46 = vld [vmem:[%s2398_s0 + $0x70] sm:$0xff]  ;;  %v67_v47 = vld [vmem:[%s2398_s0 + $0x38] sm:$0xff]  ;;  %43 = vst.msk [vmem:[#allocation2 + $0x78] sm:$0xff] %vm27_vm0, %v1380_v49  ;;  %v1598_v62 = vld [vmem:[%s2400_s3] ss:$0 sm:$0xff]  ;;  %v458_v49 = vadd.s32 40, %v1587_v57 }
  0x11   :  { %v75_v48 = vld [vmem:[%s2398_s0 + $0x78] sm:$0xff]  ;;  %v1606_v1 = vld [vmem:[%s2401_s5] ss:$0 sm:$0xff] }
  0x12   :  { %299 = vperm.xlu1 %1314, %v267_v16   ;;  %296 = vperm.xlu0 %1313, %v266_v17   ;;  %v463_v17 = vadd.s32 80, %v1587_v57 }
  0x13   :  { %1231 = vmatpush3.xpose.msra.mxu0 %v87_v8  ;;  %1298 = vmatpush3.xpose.msra.mxu1 %v87_v8 }
  0x14   :  { %1232 = vmatprep.subr.mxu0 %v86_v12  ;;  %1283 = vmatprep.subr.mxu1 %v86_v12  ;;  %vm500_vm15 = vcmp.ne.s32.totalorder %v463_v17, %v1593_v61 }
  0x16   :  { %305 = vperm.xlu1 %1314, %v269_v19   ;;  %302 = vperm.xlu0 %1313, %v268_v20  }
  0x17   :  { %1233 = vmatpush3.xpose.msra.mxu0 %v86_v12  ;;  %1299 = vmatpush3.xpose.msra.mxu1 %v86_v12 }
  0x18   :  { %1234 = vmatprep.subr.mxu0 %v85_v15  ;;  %1284 = vmatprep.subr.mxu1 %v85_v15 }
  0x1a   :  { %311 = vperm.xlu1 %1314, %v271_v22   ;;  %308 = vperm.xlu0 %1313, %v270_v23  }
  0x1b   :  { %1235 = vmatpush3.xpose.msra.mxu0 %v85_v15  ;;  %1300 = vmatpush3.xpose.msra.mxu1 %v85_v15 }
  0x1c   :  { %1236 = vmatprep.subr.mxu0 %v84_v18  ;;  %1285 = vmatprep.subr.mxu1 %v84_v18 }
  0x1e   :  { %317 = vperm.xlu1 %1314, %v273_v25   ;;  %314 = vperm.xlu0 %1313, %v272_v26   ;;  %v1381_v25 = vmov inf  }
  0x1f   :  { %1237 = vmatpush3.xpose.msra.mxu0 %v84_v18  ;;  %1301 = vmatpush3.xpose.msra.mxu1 %v84_v18  ;;  %v456_v18 = vadd.s32 24, %v1587_v57  ;;  %45 = vst.msk [vmem:[#allocation3 + $0x8] sm:$0xff] %vm27_vm0, %v1381_v25  ;;  %44 = vst.msk [vmem:[#allocation3] sm:$0xff] %vm27_vm0, %v1381_v25 }
  0x20   :  { %1238 = vmatprep.subr.mxu0 %v83_v21  ;;  %1286 = vmatprep.subr.mxu1 %v83_v21  ;;  %46 = vst.msk [vmem:[#allocation3 + $0x10] sm:$0xff] %vm27_vm0, %v1381_v25  ;;  %47 = vst.msk [vmem:[#allocation3 + $0x18] sm:$0xff] %vm27_vm0, %v1381_v25 }
  0x21   :  { %48 = vst.msk [vmem:[#allocation3 + $0x20] sm:$0xff] %vm27_vm0, %v1381_v25  ;;  %49 = vst.msk [vmem:[#allocation3 + $0x28] sm:$0xff] %vm27_vm0, %v1381_v25 }
  0x22   :  { %323 = vperm.xlu1 %1314, %v275_v28   ;;  %320 = vperm.xlu0 %1313, %v274_v29   ;;  %50 = vst.msk [vmem:[#allocation3 + $0x30] sm:$0xff] %vm27_vm0, %v1381_v25  ;;  %51 = vst.msk [vmem:[#allocation3 + $0x38] sm:$0xff] %vm27_vm0, %v1381_v25 }
  0x23   :  { %1239 = vmatpush3.xpose.msra.mxu0 %v83_v21  ;;  %1302 = vmatpush3.xpose.msra.mxu1 %v83_v21  ;;  %52 = vst.msk [vmem:[#allocation3 + $0x40] sm:$0xff] %vm27_vm0, %v1381_v25  ;;  %53 = vst.msk [vmem:[#allocation3 + $0x48] sm:$0xff] %vm27_vm0, %v1381_v25 }
  0x24   :  { %1240 = vmatprep.subr.mxu0 %v82_v24  ;;  %1287 = vmatprep.subr.mxu1 %v82_v24  ;;  %54 = vst.msk [vmem:[#allocation3 + $0x50] sm:$0xff] %vm27_vm0, %v1381_v25  ;;  %55 = vst.msk [vmem:[#allocation3 + $0x58] sm:$0xff] %vm27_vm0, %v1381_v25 }
  0x25   :  { %56 = vst.msk [vmem:[#allocation3 + $0x60] sm:$0xff] %vm27_vm0, %v1381_v25  ;;  %57 = vst.msk [vmem:[#allocation3 + $0x68] sm:$0xff] %vm27_vm0, %v1381_v25 }
  0x26   :  { %58 = vst.msk [vmem:[#allocation3 + $0x70] sm:$0xff] %vm27_vm0, %v1381_v25  ;;  %59 = vst.msk [vmem:[#allocation3 + $0x78] sm:$0xff] %vm27_vm0, %v1381_v25 }
  0x27   :  { %1241 = vmatpush3.xpose.msra.mxu0 %v82_v24  ;;  %1303 = vmatpush3.xpose.msra.mxu1 %v82_v24  ;;  %v464_v24 = vadd.s32 88, %v1587_v57 }
  0x28   :  { %1242 = vmatprep.subr.mxu0 %v81_v27  ;;  %1288 = vmatprep.subr.mxu1 %v81_v27 }
  0x2b   :  { %1243 = vmatpush3.xpose.msra.mxu0 %v81_v27  ;;  %1304 = vmatpush3.xpose.msra.mxu1 %v81_v27 }
  0x2c   :  { %1244 = vmatprep.subr.mxu0 %v80_v30  ;;  %1289 = vmatprep.subr.mxu1 %v80_v30 }
  0x2f   :  { %1245 = vmatpush3.xpose.msra.mxu0 %v80_v30  ;;  %1305 = vmatpush3.xpose.msra.mxu1 %v80_v30 }
  0x30   :  { %1246 = vmatprep.subr.mxu0 %v79_v31  ;;  %1290 = vmatprep.subr.mxu1 %v79_v31 }
  0x33   :  { %1247 = vmatpush3.xpose.msra.mxu0 %v79_v31  ;;  %1306 = vmatpush3.xpose.msra.mxu1 %v79_v31 }
  0x34   :  { %1248 = vmatprep.subr.mxu0 %v78_v32  ;;  %1291 = vmatprep.subr.mxu1 %v78_v32 }
  0x37   :  { %1249 = vmatpush3.xpose.msra.mxu0 %v78_v32  ;;  %1307 = vmatpush3.xpose.msra.mxu1 %v78_v32 }
  0x38   :  { %1250 = vmatprep.subr.mxu0 %v77_v33  ;;  %1292 = vmatprep.subr.mxu1 %v77_v33 }
  0x3b   :  { %1251 = vmatpush3.xpose.msra.mxu0 %v77_v33  ;;  %1308 = vmatpush3.xpose.msra.mxu1 %v77_v33 }
  0x3c   :  { %1252 = vmatprep.subr.mxu0 %v76_v34  ;;  %1293 = vmatprep.subr.mxu1 %v76_v34 }
  0x3f   :  { %1253 = vmatpush3.xpose.msra.mxu0 %v76_v34  ;;  %1309 = vmatpush3.xpose.msra.mxu1 %v76_v34 }
  0x42   :  { %1255 = vmatmul.mubr.f32.vlgmr.msra.gmra.mxu0 %v61_v35  ;;  %1267 = vmatmul.mubr.f32.vlgmr.msra.gmra.mxu1 %v69_v36 }
  0x43   :  { %1257 = vmatprep.mubr.f32.mxu0 %v62_v37  ;;  %1269 = vmatprep.mubr.f32.mxu1 %v70_v38  ;;  %v457_v37 = vadd.s32 32, %v1587_v57 }
  0x46   :  { %1258 = vmatmul.mubr.f32.gmra.mxu0 %v63_v39  ;;  %1270 = vmatmul.mubr.f32.gmra.mxu1 %v71_v40 }
  0x47   :  { %1260 = vmatprep.mubr.f32.mxu0 %v64_v41  ;;  %1272 = vmatprep.mubr.f32.mxu1 %v72_v42  ;;  %v455_v42 = vadd.s32 16, %v1587_v57 }
  0x4a   :  { %1261 = vmatmul.mubr.f32.gmra.mxu0 %v65_v43  ;;  %1273 = vmatmul.mubr.f32.gmra.mxu1 %v73_v44  ;;  %v465_v43 = vadd.s32 96, %v1587_v57 }
  0x4b   :  { %1263 = vmatprep.mubr.f32.mxu0 %v66_v45  ;;  %1275 = vmatprep.mubr.f32.mxu1 %v74_v46 }
  0x4e   :  { %1264 = vmatmul.mubr.f32.gmra.mxu0 %v67_v47  ;;  %1276 = vmatmul.mubr.f32.gmra.mxu1 %v75_v48 }
  0x81   :  { %v1577_v50 = vpop.permute.xlu1 %284  ;;  %v1579_v51 = vpop.permute.xlu0 %278 }
  0x82   :  { %vm329_vm10 = vcmp.eq.s32.totalorder %v1579_v51, %v1598_v62 }
  0x83   :  { %vm506_vm14 = vmand %vm329_vm10, %vm490_vm11  ;;  %vm492_vm11 = vcmp.ne.s32.totalorder %v455_v42, %v1593_v61 }
  0x85   :  { %v1581_v52 = vpop.permute.xlu1 %287  ;;  %v282_v53 = vpop.permute.xlu0 %281 }
  0x86   :  { %vm330_vm1 = vcmp.eq.s32.totalorder %v282_v53, %v1598_v62  ;;  %vm332_vm12 = vcmp.eq.s32.totalorder %v1581_v52, %v1598_v62 }
  0x87   :  { %vm507_vm5 = vmand %vm330_vm1, %vm491_vm2 }
  0x89   :  { %v1583_v54 = vpop.permute.xlu1 %293  ;;  %v1585_v56 = vpop.permute.xlu0 %290 }
  0x8d   :  { %v1589_v58 = vpop.permute.xlu1 %299  ;;  %v1600_v63 = vpop.permute.xlu0 %296 }
  0x91   :  { %v306_v0 = vpop.permute.xlu1 %305  ;;  %v303_v7 = vpop.permute.xlu0 %302 }
  0x92   :  { %vm338_vm3 = vcmp.eq.s32.totalorder %v306_v0, %v1598_v62  ;;  %vm337_vm8 = vcmp.eq.s32.totalorder %v303_v7, %v1598_v62 }
  0x93   :  { %vm515_vm6 = vmand %vm338_vm3, %vm499_vm4 }
  0x94   :  { %vm514_vm9 = vmand %vm337_vm8, %vm498_vm7 }
  0x95   :  { %v309_v23 = vpop.permute.xlu0 %308  ;;  %v312_v31 = vpop.permute.xlu1 %311 }
  0x96   :  { %vm339_vm13 = vcmp.eq.s32.totalorder %v309_v23, %v1598_v62 }
  0x97   :  { %vm516_vm4 = vmand %vm339_vm13, %vm500_vm15 }
  0x99   :  { %v315_v48 = vpop.permute.xlu0 %314 }
  0x9a   :  { %vm341_vm15 = vcmp.eq.s32.totalorder %v315_v48, %v1598_v62 }
 0x102   :  { %v1256_v3 = vpop.f32.mrf.mxu0  ;;  %v1268_v4 = vpop.f32.mrf.mxu1 }
 0x103   :  { %v245_v5 = vsub.f32 %v1606_v1, %v1256_v3  ;;  %v253_v6 = vsub.f32 %v1606_v1, %v1268_v4  ;;  %v318_v3 = vpop.permute.xlu1 %317 }
 0x104   :  { %v198_v8 = vpop.f32.mrf.mxu1  ;;  %v158_v12 = vpop.f32.mrf.mxu0 }
 0x105   :  { %v252_v9 = vsub.f32 %v1606_v1, %v198_v8  ;;  %v547_v10 = vsel %vm515_vm6, %v253_v6, -inf  ;;  %v539_v11 = vsel %vm507_vm5, %v245_v5, -inf  ;;  %v244_v13 = vsub.f32 %v1606_v1, %v158_v12  ;;  %v321_v12 = vpop.permute.xlu0 %320 }
 0x106   :  { %572 = vmax.xlane.f32.xlu0 %v547_v10  ;;  %556 = vmax.xlane.f32.xlu1 %v539_v11  ;;  %v362_v15 = vsel %vm330_vm1, inf, %v245_v5  ;;  %v1271_v16 = vpop.f32.mrf.mxu1  ;;  %v370_v19 = vsel %vm338_vm3, inf, %v253_v6  ;;  %v1259_v21 = vpop.f32.mrf.mxu0  ;;  %vm493_vm1 = vcmp.ne.s32.totalorder %v456_v18, %v1593_v61  ;;  %vm340_vm3 = vcmp.eq.s32.totalorder %v312_v31, %v1598_v62  ;;  %v530_v31 = vld [vmem:[#allocation2 + $0x40] sm:$0xff] }
 0x107   :  { %v546_v14 = vsel %vm514_vm9, %v252_v9, -inf  ;;  %v361_v20 = vsel %vm329_vm10, inf, %v244_v13  ;;  %v247_v26 = vsub.f32 %v1606_v1, %v1259_v21  ;;  %v538_v28 = vsel %vm506_vm14, %v244_v13, -inf  ;;  %vm509_vm2 = vmand %vm332_vm12, %vm493_vm1  ;;  %v324_v21 = vpop.permute.xlu1 %323 }
 0x108   :  { %v208_v22 = vpop.f32.mrf.mxu1  ;;  %v369_v29 = vsel %vm337_vm8, inf, %v252_v9  ;;  %v168_v30 = vpop.f32.mrf.mxu0  ;;  %vm501_vm5 = vcmp.ne.s32.totalorder %v464_v24, %v1593_v61  ;;  %v255_v32 = vsub.f32 %v1606_v1, %v1271_v16  ;;  %vm331_vm6 = vcmp.eq.s32.totalorder %v1577_v50, %v1598_v62 }
 0x109   :  { %v254_v27 = vsub.f32 %v1606_v1, %v208_v22  ;;  %v246_v33 = vsub.f32 %v1606_v1, %v168_v30  ;;  %v541_v35 = vsel %vm509_vm2, %v247_v26, -inf  ;;  %vm517_vm7 = vmand %vm340_vm3, %vm501_vm5  ;;  %vm494_vm8 = vcmp.ne.s32.totalorder %v457_v37, %v1593_v61 }
 0x10a   :  { %570 = vmax.xlane.f32.xlu1 %v546_v14  ;;  %379 = vmin.xlane.f32.xlu0 %v362_v15  ;;  %v1262_v36 = vpop.f32.mrf.mxu0  ;;  %v549_v38 = vsel %vm517_vm7, %v255_v32, -inf  ;;  %v1274_v40 = vpop.f32.mrf.mxu1  ;;  %vm333_vm9 = vcmp.eq.s32.totalorder %v1585_v56, %v1598_v62  ;;  %v364_v45 = vsel %vm332_vm12, inf, %v247_v26  ;;  %vm502_vm14 = vcmp.ne.s32.totalorder %v465_v43, %v1593_v61  ;;  %vm508_vm12 = vmand %vm331_vm6, %vm492_vm11  ;;  %v531_v26 = vld [vmem:[#allocation2 + $0x48] sm:$0xff]  ;;  %v522_v43 = vld [vmem:[#allocation2] sm:$0xff] }
 0x10b   :  { %v548_v34 = vsel %vm516_vm4, %v254_v27, -inf  ;;  %v363_v39 = vsel %vm331_vm6, inf, %v246_v33  ;;  %v371_v46 = vsel %vm339_vm13, inf, %v254_v27  ;;  %vm510_vm10 = vmand %vm333_vm9, %vm494_vm8  ;;  %v372_v52 = vsel %vm340_vm3, inf, %v255_v32  ;;  %v523_v27 = vld [vmem:[#allocation2 + $0x8] sm:$0xff] }
 0x10c   :  { %v178_v41 = vpop.f32.mrf.mxu0  ;;  %v218_v47 = vpop.f32.mrf.mxu1  ;;  %vm518_vm13 = vmand %vm341_vm15, %vm502_vm14  ;;  %vm495_vm1 = vcmp.ne.s32.totalorder %v458_v49, %v1593_v61  ;;  %vm334_vm2 = vcmp.eq.s32.totalorder %v1583_v54, %v1598_v62  ;;  %v249_v59 = vsub.f32 %v1606_v1, %v1262_v36  ;;  %v540_v60 = vsel %vm508_vm12, %v246_v33, -inf  ;;  %v346_v32 = vld [vmem:[#allocation3 + $0x8] sm:$0xff]  ;;  %v345_v36 = vld [vmem:[#allocation3] sm:$0xff] }
 0x10d   :  { %v248_v44 = vsub.f32 %v1606_v1, %v178_v41  ;;  %v256_v51 = vsub.f32 %v1606_v1, %v218_v47  ;;  %vm511_vm3 = vmand %vm334_vm2, %vm495_vm1  ;;  %vm503_vm4 = vcmp.ne.s32.totalorder %v466_v55, %v1593_v61  ;;  %v459_v50 = vadd.s32 48, %v1587_v57 }
 0x10e   :  { %395 = vmin.xlane.f32.xlu0 %v370_v19  ;;  %377 = vmin.xlane.f32.xlu1 %v361_v20  ;;  %v1265_v2 = vpop.f32.mrf.mxu0  ;;  %vm342_vm5 = vcmp.eq.s32.totalorder %v318_v3, %v1598_v62  ;;  %v257_v4 = vsub.f32 %v1606_v1, %v1274_v40  ;;  %v543_v5 = vsel %vm511_vm3, %v249_v59, -inf  ;;  %v1277_v7 = vpop.f32.mrf.mxu1  ;;  %v467_v9 = vadd.s32 112, %v1587_v57  ;;  %v721_v40 = vld [vmem:[%s2402_s4 + $0x8] sm:$0xff] }
 0x10f   :  { %v542_v53 = vsel %vm510_vm10, %v248_v44, -inf  ;;  %v550_v0 = vsel %vm518_vm13, %v256_v51, -inf  ;;  %v365_v6 = vsel %vm333_vm9, inf, %v248_v44  ;;  %vm519_vm6 = vmand %vm342_vm5, %vm503_vm4  ;;  %vm496_vm7 = vcmp.ne.s32.totalorder %v459_v50, %v1593_v61 }
 0x110   :  { %v188_v8 = vpop.f32.mrf.mxu0  ;;  %vm335_vm8 = vcmp.eq.s32.totalorder %v1600_v63, %v1598_v62  ;;  %v551_v11 = vsel %vm519_vm6, %v257_v4, -inf  ;;  %v373_v56 = vsel %vm341_vm15, inf, %v256_v51  ;;  %v228_v13 = vpop.f32.mrf.mxu1  ;;  %vm504_vm10 = vcmp.ne.s32.totalorder %v467_v9, %v1593_v61  ;;  %v525_v9 = vld [vmem:[#allocation2 + $0x18] sm:$0xff] }
 0x111   :  { %v250_v10 = vsub.f32 %v1606_v1, %v188_v8  ;;  %vm512_vm9 = vmand %vm335_vm8, %vm496_vm7  ;;  %v460_v14 = vadd.s32 56, %v1587_v57  ;;  %vm343_vm11 = vcmp.eq.s32.totalorder %v321_v12, %v1598_v62  ;;  %v258_v15 = vsub.f32 %v1606_v1, %v228_v13  ;;  %v532_v8 = vld [vmem:[#allocation2 + $0x50] sm:$0xff] }
 0x112   :  { %554 = vmax.xlane.f32.xlu0 %v538_v28  ;;  %393 = vmin.xlane.f32.xlu1 %v369_v29  ;;  %v366_v16 = vsel %vm334_vm2, inf, %v249_v59  ;;  %vm520_vm14 = vmand %vm343_vm11, %vm504_vm10  ;;  %v468_v18 = vadd.s32 120, %v1587_v57  ;;  %vm336_vm12 = vcmp.eq.s32.totalorder %v1589_v58, %v1598_v62  ;;  %v251_v19 = vsub.f32 %v1606_v1, %v1265_v2 }
 0x113   :  { %v544_v17 = vsel %vm512_vm9, %v250_v10, -inf  ;;  %vm497_vm15 = vcmp.ne.s32.totalorder %v460_v14, %v1593_v61  ;;  %v374_v20 = vsel %vm342_vm5, inf, %v257_v4  ;;  %v552_v54 = vsel %vm520_vm14, %v258_v15, -inf  ;;  %v728_v4 = vld [vmem:[%s2402_s4 + $0x40] sm:$0xff] }
 0x114   :  { %vm513_vm13 = vmand %vm336_vm12, %vm497_vm15  ;;  %vm505_vm1 = vcmp.ne.s32.totalorder %v468_v18, %v1593_v61  ;;  %vm344_vm2 = vcmp.eq.s32.totalorder %v324_v21, %v1598_v62  ;;  %v259_v57 = vsub.f32 %v1606_v1, %v1277_v7  ;;  %v367_v23 = vsel %vm335_vm8, inf, %v250_v10  ;;  %v354_v62 = vld [vmem:[#allocation3 + $0x48] sm:$0xff] }
 0x115   :  { %v545_v22 = vsel %vm513_vm13, %v251_v19, -inf  ;;  %vm521_vm3 = vmand %vm344_vm2, %vm505_vm1  ;;  %v375_v25 = vsel %vm343_vm11, inf, %v258_v15  ;;  %v368_v61 = vsel %vm336_vm12, inf, %v251_v19 }
 0x116   :  { %574 = vmax.xlane.f32.xlu1 %v548_v34  ;;  %560 = vmax.xlane.f32.xlu0 %v541_v35  ;;  %v553_v24 = vsel %vm521_vm3, %v259_v57, -inf  ;;  %v376_v1 = vsel %vm344_vm2, inf, %v259_v57 }
 0x11a   :  { %576 = vmax.xlane.f32.xlu0 %v549_v38  ;;  %381 = vmin.xlane.f32.xlu1 %v363_v39  ;;  %v729_v39 = vld [vmem:[%s2402_s4 + $0x48] sm:$0xff] }
 0x11e   :  { %383 = vmin.xlane.f32.xlu0 %v364_v45  ;;  %397 = vmin.xlane.f32.xlu1 %v371_v46  ;;  %v353_v46 = vld [vmem:[#allocation3 + $0x40] sm:$0xff] }
 0x122   :  { %399 = vmin.xlane.f32.xlu0 %v372_v52  ;;  %562 = vmax.xlane.f32.xlu1 %v542_v53 }
 0x126   :  { %558 = vmax.xlane.f32.xlu0 %v540_v60  ;;  %578 = vmax.xlane.f32.xlu1 %v550_v0 }
 0x12a   :  { %564 = vmax.xlane.f32.xlu0 %v543_v5  ;;  %385 = vmin.xlane.f32.xlu1 %v365_v6 }
 0x12e   :  { %580 = vmax.xlane.f32.xlu0 %v551_v11  ;;  %401 = vmin.xlane.f32.xlu1 %v373_v56  ;;  %v720_v11 = vld [vmem:[%s2402_s4] sm:$0xff] }
 0x132   :  { %387 = vmin.xlane.f32.xlu0 %v366_v16  ;;  %566 = vmax.xlane.f32.xlu1 %v544_v17  ;;  %v533_v16 = vld [vmem:[#allocation2 + $0x58] sm:$0xff]  ;;  %v347_v17 = vld [vmem:[#allocation3 + $0x10] sm:$0xff] }
 0x136   :  { %403 = vmin.xlane.f32.xlu0 %v374_v20  ;;  %582 = vmax.xlane.f32.xlu1 %v552_v54 }
 0x13a   :  { %568 = vmax.xlane.f32.xlu0 %v545_v22  ;;  %389 = vmin.xlane.f32.xlu1 %v367_v23 }
 0x13e   :  { %584 = vmax.xlane.f32.xlu0 %v553_v24  ;;  %405 = vmin.xlane.f32.xlu1 %v375_v25 }
 0x142   :  { %391 = vmin.xlane.f32.xlu0 %v368_v61 }
 0x146   :  { %407 = vmin.xlane.f32.xlu0 %v376_v1 }
 0x18f   :  { %v573_v63 = vpop.xlane.xlu0 %572  ;;  %v557_v28 = vpop.xlane.xlu1 %556 }
 0x190   :  { %v595_v29 = vmax.f32 %v531_v26, %v573_v63  ;;  %v587_v30 = vmax.f32 %v523_v27, %v557_v28  ;;  %v348_v26 = vld [vmem:[#allocation3 + $0x18] sm:$0xff]  ;;  %v355_v27 = vld [vmem:[#allocation3 + $0x50] sm:$0xff] }
 0x192   :  { %611 = vst.msk [vmem:[#allocation2 + $0x48] sm:$0xff] %vm27_vm0, %v595_v29  ;;  %603 = vst.msk [vmem:[#allocation2 + $0x8] sm:$0xff] %vm27_vm0, %v587_v30 }
 0x193   :  { %v571_v33 = vpop.xlane.xlu1 %570  ;;  %v380_v34 = vpop.xlane.xlu0 %379 }
 0x194   :  { %v594_v35 = vmax.f32 %v530_v31, %v571_v33  ;;  %v410_v58 = vmin.f32 %v346_v32, %v380_v34 }
 0x196   :  { %610 = vst.msk [vmem:[#allocation2 + $0x40] sm:$0xff] %vm27_vm0, %v594_v35  ;;  %427 = vst.msk [vmem:[#allocation3 + $0x8] sm:$0xff] %vm27_vm0, %v410_v58  ;;  %v356_v35 = vld [vmem:[#allocation3 + $0x58] sm:$0xff]  ;;  %v526_v58 = vld [vmem:[#allocation2 + $0x20] sm:$0xff] }
 0x197   :  { %v396_v37 = vpop.xlane.xlu0 %395  ;;  %v378_v38 = vpop.xlane.xlu1 %377 }
 0x198   :  { %v418_v41 = vmin.f32 %v354_v62, %v396_v37  ;;  %v409_v42 = vmin.f32 %v345_v36, %v378_v38 }
 0x199   :  { %v1779_v44 = vld [vmem:[#allocation2 + $0x48] sm:$0xff] }
 0x19a   :  { %v1781_v45 = vld [vmem:[#allocation2 + $0x8] sm:$0xff]  ;;  %v777_v47 = vmul.f32 2.0, %v1779_v44  ;;  %435 = vst.msk [vmem:[#allocation3 + $0x48] sm:$0xff] %vm27_vm0, %v418_v41  ;;  %426 = vst.msk [vmem:[#allocation3] sm:$0xff] %vm27_vm0, %v409_v42  ;;  %vm841_vm7 = vcmp.gt.f32.partialorder %v1779_v44, -inf }
 0x19b   :  { %v769_v48 = vmul.f32 2.0, %v1781_v45  ;;  %v555_v49 = vpop.xlane.xlu0 %554  ;;  %v394_v51 = vpop.xlane.xlu1 %393  ;;  %vm833_vm6 = vcmp.gt.f32.partialorder %v1781_v45, -inf }
 0x19c   :  { %v793_v52 = vadd.f32 %v777_v47, %v729_v39  ;;  %v586_v55 = vmax.f32 %v522_v43, %v555_v49  ;;  %v417_v59 = vmin.f32 %v353_v46, %v394_v51 }
 0x19d   :  { %v785_v53 = vadd.f32 %v769_v48, %v721_v40  ;;  %v1787_v60 = vld [vmem:[#allocation2 + $0x40] sm:$0xff]  ;;  %v753_v0 = vld [vmem:[#allocation3 + $0x8] sm:$0xff] }
 0x19e   :  { %v1789_v2 = vmax.f32 %v793_v52, 0.0  ;;  %v776_v50 = vmul.f32 2.0, %v1787_v60  ;;  %602 = vst.msk [vmem:[#allocation2] sm:$0xff] %vm27_vm0, %v586_v55  ;;  %434 = vst.msk [vmem:[#allocation3 + $0x40] sm:$0xff] %vm27_vm0, %v417_v59  ;;  %v801_v5 = vmul.f32 2.0, %v753_v0  ;;  %v1846_v55 = vld [vmem:[%s2402_s4 + $0x50] sm:$0xff] }
 0x19f   :  { %v1791_v3 = vmax.f32 %v785_v53, 0.0  ;;  %v575_v6 = vpop.xlane.xlu1 %574  ;;  %v561_v7 = vpop.xlane.xlu0 %560  ;;  %v1851_v59 = vld [vmem:[%s2402_s4 + $0x18] sm:$0xff] }
 0x1a0   :  { %1315 = vrsqrt.f32 %v1789_v2  ;;  %v792_v12 = vadd.f32 %v776_v50, %v728_v4  ;;  %v817_v13 = vadd.f32 %v801_v5, %v721_v40  ;;  %v596_v18 = vmax.f32 %v532_v8, %v575_v6 }
 0x1a1   :  { %1317 = vrsqrt.f32 %v1791_v3  ;;  %v761_v10 = vld [vmem:[#allocation3 + $0x48] sm:$0xff]  ;;  %v752_v56 = vld [vmem:[#allocation3] sm:$0xff]  ;;  %v589_v19 = vmax.f32 %v525_v9, %v561_v7  ;;  %vm929_vm4 = vcmp.eq.f32.partialorder %v1789_v2, inf  ;;  %vm931_vm5 = vcmp.eq.f32.partialorder %v1789_v2, 0.0 }
 0x1a2   :  { %v809_v14 = vmul.f32 2.0, %v761_v10  ;;  %v800_v15 = vmul.f32 2.0, %v752_v56  ;;  %v1804_v21 = vmax.f32 %v792_v12, 0.0  ;;  %v1806_v57 = vmax.f32 %v817_v13, 0.0  ;;  %612 = vst.msk [vmem:[#allocation2 + $0x50] sm:$0xff] %vm27_vm0, %v596_v18  ;;  %v1880_v13 = vld [vmem:[%s2402_s4 + $0x58] sm:$0xff] }
 0x1a3   :  { %v577_v20 = vpop.xlane.xlu0 %576  ;;  %v382_v54 = vpop.xlane.xlu1 %381  ;;  %605 = vst.msk [vmem:[#allocation2 + $0x18] sm:$0xff] %vm27_vm0, %v589_v19  ;;  %vm873_vm8 = vcmp.eq.f32.partialorder %v1791_v3, inf  ;;  %vm875_vm9 = vcmp.eq.f32.partialorder %v1791_v3, 0.0  ;;  %v876_v6 = vand.u32 2147483648, %v1791_v3 }
 0x1a4   :  { %v825_v22 = vadd.f32 %v809_v14, %v729_v39  ;;  %v816_v23 = vadd.f32 %v800_v15, %v720_v11  ;;  %v597_v25 = vmax.f32 %v533_v16, %v577_v20  ;;  %v411_v61 = vmin.f32 %v347_v17, %v382_v54 }
 0x1a5   :  { %v1808_v24 = vld [vmem:[#allocation2] sm:$0xff]  ;;  %1319 = vrsqrt.f32 %v1804_v21  ;;  %vm922_vm10 = vcmp.eq.f32.partialorder %v1804_v21, inf  ;;  %v925_v7 = vand.u32 2147483648, %v1804_v21  ;;  %vm1017_vm11 = vcmp.eq.f32.partialorder %v1806_v57, inf }
 0x1a6   :  { %v760_v1 = vld [vmem:[#allocation3 + $0x40] sm:$0xff]  ;;  %1321 = vrsqrt.f32 %v1806_v57  ;;  %613 = vst.msk [vmem:[#allocation2 + $0x58] sm:$0xff] %vm27_vm0, %v597_v25  ;;  %428 = vst.msk [vmem:[#allocation3 + $0x10] sm:$0xff] %vm27_vm0, %v411_v61  ;;  %v1816_v29 = vmax.f32 %v825_v22, 0.0  ;;  %v1818_v30 = vmax.f32 %v816_v23, 0.0  ;;  %v768_v31 = vmul.f32 2.0, %v1808_v24 }
 0x1a7   :  { %v384_v63 = vpop.xlane.xlu0 %383  ;;  %v398_v28 = vpop.xlane.xlu1 %397  ;;  %v808_v32 = vmul.f32 2.0, %v760_v1  ;;  %vm1019_vm14 = vcmp.eq.f32.partialorder %v1806_v57, 0.0  ;;  %v1020_v12 = vand.u32 2147483648, %v1806_v57  ;;  %vm924_vm12 = vcmp.eq.f32.partialorder %v1804_v21, 0.0 }
 0x1a8   :  { %v412_v33 = vmin.f32 %v348_v26, %v384_v63  ;;  %v419_v34 = vmin.f32 %v355_v27, %v398_v28  ;;  %1323 = vrsqrt.f32 %v1816_v29  ;;  %v784_v62 = vadd.f32 %v768_v31, %v720_v11 }
 0x1a9   :  { %1325 = vrsqrt.f32 %v1818_v30  ;;  %v824_v38 = vadd.f32 %v808_v32, %v728_v4  ;;  %v1825_v39 = vld [vmem:[#allocation2 + $0x50] sm:$0xff]  ;;  %v932_v4 = vand.u32 2147483648, %v1789_v2  ;;  %vm1073_vm15 = vcmp.eq.f32.partialorder %v1816_v29, inf }
 0x1aa   :  { %429 = vst.msk [vmem:[#allocation3 + $0x18] sm:$0xff] %vm27_vm0, %v412_v33  ;;  %436 = vst.msk [vmem:[#allocation3 + $0x50] sm:$0xff] %vm27_vm0, %v419_v34  ;;  %v1827_v40 = vld [vmem:[#allocation2 + $0x18] sm:$0xff]  ;;  %v1829_v46 = vmax.f32 %v784_v62, 0.0  ;;  %v778_v49 = vmul.f32 2.0, %v1825_v39  ;;  %vm1075_vm13 = vcmp.eq.f32.partialorder %v1816_v29, 0.0 }
 0x1ab   :  { %v400_v36 = vpop.xlane.xlu0 %399  ;;  %v563_v37 = vpop.xlane.xlu1 %562  ;;  %v1832_v48 = vmax.f32 %v824_v38, 0.0  ;;  %v771_v51 = vmul.f32 2.0, %v1827_v40  ;;  %v1076_v19 = vand.u32 2147483648, %v1816_v29  ;;  %vm1010_vm1 = vcmp.eq.f32.partialorder %v1818_v30, inf }
 0x1ac   :  { %v420_v41 = vmin.f32 %v356_v35, %v400_v36  ;;  %v590_v42 = vmax.f32 %v526_v58, %v563_v37  ;;  %1327 = vrsqrt.f32 %v1829_v46  ;;  %v794_v9 = vadd.f32 %v778_v49, %v1846_v55 }
 0x1ad   :  { %v1316_v43 = vpop.eup %1315  ;;  %1329 = vrsqrt.f32 %v1832_v48  ;;  %v1862_v5 = vld [vmem:[#allocation2 + $0x58] sm:$0xff]  ;;  %v787_v10 = vadd.f32 %v771_v51, %v1851_v59  ;;  %v1013_v61 = vand.u32 2147483648, %v1818_v30  ;;  %vm866_vm2 = vcmp.eq.f32.partialorder %v1829_v46, inf  ;;  %v754_v62 = vld [vmem:[#allocation3 + $0x10] sm:$0xff] }
 0x1ae   :  { %v1318_v47 = vpop.eup %1317  ;;  %437 = vst.msk [vmem:[#allocation3 + $0x58] sm:$0xff] %vm27_vm0, %v420_v41  ;;  %606 = vst.msk [vmem:[#allocation2 + $0x20] sm:$0xff] %vm27_vm0, %v590_v42  ;;  %v928_v52 = vmul.f32 %v1316_v43, %v1789_v2  ;;  %v779_v14 = vmul.f32 2.0, %v1862_v5  ;;  %v1890_v20 = vmax.f32 %v794_v9, 0.0  ;;  %vm868_vm3 = vcmp.eq.f32.partialorder %v1829_v46, 0.0 }
 0x1af   :  { %v872_v53 = vmul.f32 %v1318_v47, %v1791_v3  ;;  %v1853_v0 = vpop.xlane.xlu0 %558  ;;  %v1855_v50 = vpop.xlane.xlu1 %578  ;;  %v1892_v54 = vmax.f32 %v787_v10, 0.0  ;;  %v869_v45 = vand.u32 2147483648, %v1829_v46  ;;  %v802_v49 = vmul.f32 2.0, %v754_v62 }
 0x1b0   :  { %v930_v56 = vsel %vm929_vm4, %v1789_v2, %v928_v52  ;;  %v795_v27 = vadd.f32 %v779_v14, %v1880_v13  ;;  %vm840_vm4 = vcmp.gt.f32.partialorder %v1787_v60, -inf }
 0x1b1   :  { %v874_v8 = vsel %vm873_vm8, %v1791_v3, %v872_v53  ;;  %v755_v15 = vld [vmem:[#allocation3 + $0x18] sm:$0xff]  ;;  %v762_v22 = vld [vmem:[#allocation3 + $0x50] sm:$0xff]  ;;  %v933_v1 = vsel %vm931_vm5, %v932_v4, %v930_v56  ;;  %1331 = vrsqrt.f32 %v1892_v54  ;;  %vm832_vm5 = vcmp.gt.f32.partialorder %v1808_v24, -inf }
 0x1b2   :  { %v1320_v11 = vpop.eup %1319  ;;  %v877_v23 = vsel %vm875_vm9, %v876_v6, %v874_v8  ;;  %v803_v63 = vmul.f32 2.0, %v755_v15  ;;  %v810_v31 = vmul.f32 2.0, %v762_v22  ;;  %vm1012_vm8 = vcmp.eq.f32.partialorder %v1818_v30, 0.0  ;;  %v524_v24 = vld [vmem:[#allocation2 + $0x10] sm:$0xff] }
 0x1b3   :  { %v1883_v16 = vpop.xlane.xlu0 %564  ;;  %v1885_v17 = vpop.xlane.xlu1 %385  ;;  %v921_v26 = vmul.f32 %v1320_v11, %v1804_v21  ;;  %v977_v34 = vsel %vm833_vm6, %v877_v23, -inf  ;;  %1333 = vrsqrt.f32 %v1890_v20  ;;  %v985_v36 = vsel %vm841_vm7, %v933_v1, -inf }
 0x1b4   :  { %v1322_v18 = vpop.eup %1321  ;;  %v1932_v42 = vmax.f32 %v795_v27, 0.0  ;;  %v819_v43 = vadd.f32 %v803_v63, %v1851_v59  ;;  %v826_v51 = vadd.f32 %v810_v31, %v1846_v55  ;;  %vm1066_vm6 = vcmp.eq.f32.partialorder %v1832_v48, inf  ;;  %v1946_v59 = vld [vmem:[%s2402_s4 + $0x10] sm:$0xff] }
 0x1b5   :  { %v1016_v25 = vmul.f32 %v1322_v18, %v1806_v57  ;;  %v1324_v28 = vpop.eup %1323  ;;  %vm1068_vm7 = vcmp.eq.f32.partialorder %v1832_v48, 0.0  ;;  %v1069_v6 = vand.u32 2147483648, %v1832_v48  ;;  %v1972_v22 = vld [vmem:[#allocation2 + $0x20] sm:$0xff]  ;;  %vm835_vm9 = vcmp.gt.f32.partialorder %v1827_v40, -inf }
 0x1b6   :  { %v1326_v33 = vpop.eup %1325  ;;  %v1072_v58 = vmul.f32 %v1324_v28, %v1816_v29  ;;  %1335 = vrsqrt.f32 %v1932_v42  ;;  %v1960_v15 = vmax.f32 %v819_v43, 0.0  ;;  %v1970_v18 = vmax.f32 %v826_v51, 0.0  ;;  %v527_v51 = vld [vmem:[#allocation2 + $0x28] sm:$0xff] }
 0x1b7   :  { %v1018_v3 = vsel %vm1017_vm11, %v1806_v57, %v1016_v25  ;;  %v1909_v32 = vpop.xlane.xlu0 %580  ;;  %v1911_v2 = vpop.xlane.xlu1 %401  ;;  %v1009_v38 = vmul.f32 %v1326_v33, %v1818_v30  ;;  %v923_v57 = vsel %vm922_vm10, %v1804_v21, %v921_v26  ;;  %v772_v60 = vmul.f32 2.0, %v1972_v22 }
 0x1b8   :  { %v1021_v35 = vsel %vm1019_vm14, %v1020_v12, %v1018_v3  ;;  %v1074_v41 = vsel %vm1073_vm15, %v1816_v29, %v1072_v58  ;;  %v763_v29 = vld [vmem:[#allocation3 + $0x58] sm:$0xff]  ;;  %v926_v55 = vsel %vm924_vm12, %v925_v7, %v923_v57  ;;  %v818_v7 = vadd.f32 %v802_v49, %v1946_v59  ;;  %v534_v49 = vld [vmem:[#allocation2 + $0x60] sm:$0xff] }
 0x1b9   :  { %v1121_v37 = vsub.f32 %v977_v34, %v1021_v35  ;;  %v1077_v44 = vsel %vm1075_vm13, %v1076_v19, %v1074_v41  ;;  %v1328_v53 = vpop.eup %1327  ;;  %v1011_v56 = vsel %vm1010_vm1, %v1818_v30, %v1009_v38  ;;  %v811_v19 = vmul.f32 2.0, %v763_v29  ;;  %v535_v29 = vld [vmem:[#allocation2 + $0x68] sm:$0xff] }
 0x1ba   :  { %v1129_v4 = vsub.f32 %v985_v36, %v1077_v44  ;;  %v1330_v9 = vpop.eup %1329  ;;  %v865_v11 = vmul.f32 %v1328_v53, %v1829_v46  ;;  %1337 = vrsqrt.f32 %v1960_v15  ;;  %v984_v27 = vsel %vm840_vm4, %v926_v55, -inf  ;;  %v349_v53 = vld [vmem:[#allocation3 + $0x20] sm:$0xff]  ;;  %v350_v55 = vld [vmem:[#allocation3 + $0x28] sm:$0xff] }
 0x1bb   :  { %v1137_v47 = vadd.f32 0.3, %v1121_v37  ;;  %v1938_v52 = vpop.xlane.xlu0 %387  ;;  %v1948_v8 = vpop.xlane.xlu1 %566  ;;  %v1065_v14 = vmul.f32 %v1330_v9, %v1832_v48  ;;  %v1014_v28 = vsel %vm1012_vm8, %v1013_v61, %v1011_v56  ;;  %1339 = vrsqrt.f32 %v1970_v18  ;;  %v357_v9 = vld [vmem:[#allocation3 + $0x60] sm:$0xff]  ;;  %v528_v56 = vld [vmem:[#allocation2 + $0x30] sm:$0xff] }
 0x1bc   :  { %v1145_v12 = vadd.f32 0.3, %v1129_v4  ;;  %v867_v21 = vsel %vm866_vm2, %v1829_v46, %v865_v11  ;;  %v827_v30 = vadd.f32 %v811_v19, %v1880_v13  ;;  %v2009_v37 = vmax.f32 %v818_v7, 0.0 }
 0x1bd   :  { %v1153_v10 = vmax.f32 %v1137_v47, 0.0  ;;  %v870_v1 = vsel %vm868_vm3, %v869_v45, %v867_v21  ;;  %v1067_v26 = vsel %vm1066_vm6, %v1832_v48, %v1065_v14  ;;  %v2004_v48 = vld [vmem:[%s2402_s4 + $0x20] sm:$0xff]  ;;  %v588_v38 = vmax.f32 %v524_v24, %v1853_v0 }
 0x1be   :  { %v1161_v25 = vmax.f32 %v1145_v12, 0.0  ;;  %v976_v63 = vsel %vm832_vm5, %v870_v1, -inf  ;;  %v1070_v46 = vsel %vm1068_vm7, %v1069_v6, %v1067_v26  ;;  %v1332_v34 = vpop.eup %1331  ;;  %v2011_v45 = vmax.f32 %v827_v30, 0.0  ;;  %v358_v12 = vld [vmem:[#allocation3 + $0x68] sm:$0xff]  ;;  %v359_v30 = vld [vmem:[#allocation3 + $0x70] sm:$0xff] }
 0x1bf   :  { %1169 = vst.msk [vmem:[%s2403_s6 + $0x8] sm:$0xff] %vm27_vm0, %v1153_v10  ;;  %v1974_v23 = vpop.xlane.xlu0 %403  ;;  %v1120_v3 = vsub.f32 %v976_v63, %v1014_v28  ;;  %v1128_v31 = vsub.f32 %v984_v27, %v1070_v46  ;;  %v1998_v33 = vpop.xlane.xlu1 %582  ;;  %v886_v36 = vmul.f32 %v1332_v34, %v1892_v54  ;;  %v788_v41 = vadd.f32 %v772_v60, %v2004_v48  ;;  %v529_v46 = vld [vmem:[#allocation2 + $0x38] sm:$0xff] }
 0x1c0   :  { %1177 = vst.msk [vmem:[%s2403_s6 + $0x48] sm:$0xff] %vm27_vm0, %v1161_v25  ;;  %v1334_v62 = vpop.eup %1333  ;;  %vm936_vm10 = vcmp.eq.f32.partialorder %v1890_v20, inf  ;;  %vm938_vm11 = vcmp.eq.f32.partialorder %v1890_v20, 0.0  ;;  %v939_v43 = vand.u32 2147483648, %v1890_v20  ;;  %1341 = vrsqrt.f32 %v2011_v45  ;;  %604 = vst.msk [vmem:[#allocation2 + $0x10] sm:$0xff] %vm27_vm0, %v588_v38  ;;  %v536_v25 = vld [vmem:[#allocation2 + $0x70] sm:$0xff] }
 0x1c1   :  { %v1136_v35 = vadd.f32 0.3, %v1120_v3  ;;  %v1144_v58 = vadd.f32 0.3, %v1128_v31  ;;  %v935_v0 = vmul.f32 %v1334_v62, %v1890_v20  ;;  %vm887_vm14 = vcmp.eq.f32.partialorder %v1892_v54, inf  ;;  %v351_v31 = vld [vmem:[#allocation3 + $0x30] sm:$0xff] }
 0x1c2   :  { %vm889_vm15 = vcmp.eq.f32.partialorder %v1892_v54, 0.0  ;;  %v890_v44 = vand.u32 2147483648, %v1892_v54  ;;  %v888_v6 = vsel %vm887_vm14, %v1892_v54, %v886_v36  ;;  %vm943_vm12 = vcmp.eq.f32.partialorder %v1932_v42, inf  ;;  %v352_v34 = vld [vmem:[#allocation3 + $0x38] sm:$0xff] }
 0x1c3   :  { %v2006_v61 = vpop.xlane.xlu0 %568  ;;  %v1152_v13 = vmax.f32 %v1136_v35, 0.0  ;;  %v1160_v57 = vmax.f32 %v1144_v58, 0.0  ;;  %v2035_v4 = vpop.xlane.xlu1 %389  ;;  %1343 = vrsqrt.f32 %v2009_v37  ;;  %vm1031_vm13 = vcmp.eq.f32.partialorder %v1960_v15, inf  ;;  %v360_v36 = vld [vmem:[#allocation3 + $0x78] sm:$0xff] }
 0x1c4   :  { %vm842_vm1 = vcmp.gt.f32.partialorder %v1825_v39, -inf  ;;  %vm1033_vm2 = vcmp.eq.f32.partialorder %v1960_v15, 0.0  ;;  %v1034_v10 = vand.u32 2147483648, %v1960_v15  ;;  %vm1080_vm3 = vcmp.eq.f32.partialorder %v1970_v18, inf  ;;  %v1336_v14 = vpop.eup %1335 }
 0x1c5   :  { %1168 = vst.msk [vmem:[%s2403_s6] sm:$0xff] %vm27_vm0, %v1152_v13  ;;  %1176 = vst.msk [vmem:[%s2403_s6 + $0x40] sm:$0xff] %vm27_vm0, %v1160_v57  ;;  %v2045_v11 = vmax.f32 %v788_v41, 0.0  ;;  %vm1082_vm4 = vcmp.eq.f32.partialorder %v1970_v18, 0.0  ;;  %v598_v21 = vmax.f32 %v534_v49, %v1855_v50  ;;  %v591_v7 = vmax.f32 %v527_v51, %v1883_v16 }
 0x1c6   :  { %v413_v19 = vmin.f32 %v349_v53, %v1885_v17  ;;  %v937_v26 = vsel %vm936_vm10, %v1890_v20, %v935_v0  ;;  %v891_v27 = vsel %vm889_vm15, %v890_v44, %v888_v6  ;;  %v599_v63 = vmax.f32 %v535_v29, %v1909_v32  ;;  %v537_v32 = vld [vmem:[#allocation2 + $0x78] sm:$0xff] }
 0x1c7   :  { %v2021_v47 = vpop.xlane.xlu0 %584  ;;  %v421_v28 = vmin.f32 %v357_v9, %v1911_v2  ;;  %v1338_v3 = vpop.eup %1337  ;;  %v1083_v50 = vand.u32 2147483648, %v1970_v18  ;;  %614 = vst.msk [vmem:[#allocation2 + $0x60] sm:$0xff] %vm27_vm0, %v598_v21  ;;  %607 = vst.msk [vmem:[#allocation2 + $0x28] sm:$0xff] %vm27_vm0, %v591_v7  ;;  %v414_v16 = vmin.f32 %v350_v55, %v1938_v52  ;;  %v592_v17 = vmax.f32 %v528_v56, %v1948_v8  ;;  %v2068_v24 = vld [vmem:[#allocation2 + $0x10] sm:$0xff]  ;;  %v732_v56 = vld [vmem:[%s2402_s4 + $0x60] sm:$0xff] }
 0x1c8   :  { %430 = vst.msk [vmem:[#allocation3 + $0x20] sm:$0xff] %vm27_vm0, %v413_v19  ;;  %v422_v54 = vmin.f32 %v358_v12, %v1974_v23  ;;  %v942_v2 = vmul.f32 %v1336_v14, %v1932_v42  ;;  %v1030_v60 = vmul.f32 %v1338_v3, %v1960_v15  ;;  %1345 = vrsqrt.f32 %v2045_v11  ;;  %615 = vst.msk [vmem:[#allocation2 + $0x68] sm:$0xff] %vm27_vm0, %v599_v63  ;;  %v406_v8 = vpop.xlane.xlu1 %405  ;;  %v1340_v23 = vpop.eup %1339 }
 0x1c9   :  { %438 = vst.msk [vmem:[#allocation3 + $0x60] sm:$0xff] %vm27_vm0, %v421_v28  ;;  %v600_v52 = vmax.f32 %v536_v25, %v1998_v33  ;;  %v940_v35 = vsel %vm938_vm11, %v939_v43, %v937_v26  ;;  %v979_v58 = vsel %vm835_vm9, %v891_v27, -inf  ;;  %v770_v62 = vmul.f32 2.0, %v2068_v24  ;;  %431 = vst.msk [vmem:[#allocation3 + $0x28] sm:$0xff] %vm27_vm0, %v414_v16 }
 0x1ca   :  { %608 = vst.msk [vmem:[#allocation2 + $0x30] sm:$0xff] %vm27_vm0, %v592_v17  ;;  %439 = vst.msk [vmem:[#allocation3 + $0x68] sm:$0xff] %vm27_vm0, %v422_v54  ;;  %v593_v33 = vmax.f32 %v529_v46, %v2006_v61  ;;  %v1032_v20 = vsel %vm1031_vm13, %v1960_v15, %v1030_v60  ;;  %v1079_v13 = vmul.f32 %v1340_v23, %v1970_v18  ;;  %vm945_vm5 = vcmp.eq.f32.partialorder %v1932_v42, 0.0  ;;  %v733_v60 = vld [vmem:[%s2402_s4 + $0x68] sm:$0xff] }
 0x1cb   :  { %v392_v1 = vpop.xlane.xlu0 %391  ;;  %616 = vst.msk [vmem:[#allocation2 + $0x70] sm:$0xff] %vm27_vm0, %v600_v52  ;;  %v415_v40 = vmin.f32 %v351_v31, %v2035_v4  ;;  %v601_v57 = vmax.f32 %v537_v32, %v2021_v47  ;;  %v1035_v41 = vsel %vm1033_vm2, %v1034_v10, %v1032_v20  ;;  %v786_v43 = vadd.f32 %v770_v62, %v1946_v59 }
 0x1cc   :  { %609 = vst.msk [vmem:[#allocation2 + $0x38] sm:$0xff] %vm27_vm0, %v593_v33  ;;  %v423_v61 = vmin.f32 %v359_v30, %v406_v8  ;;  %v416_v0 = vmin.f32 %v352_v34, %v392_v1  ;;  %v944_v44 = vsel %vm943_vm12, %v1932_v42, %v942_v2  ;;  %v1123_v49 = vsub.f32 %v979_v58, %v1035_v41 }
 0x1cd   :  { %v1081_v51 = vsel %vm1080_vm3, %v1970_v18, %v1079_v13  ;;  %432 = vst.msk [vmem:[#allocation3 + $0x30] sm:$0xff] %vm27_vm0, %v415_v40  ;;  %617 = vst.msk [vmem:[#allocation2 + $0x78] sm:$0xff] %vm27_vm0, %v601_v57  ;;  %v986_v59 = vsel %vm842_vm1, %v940_v35, -inf  ;;  %v946_v47 = vand.u32 2147483648, %v1932_v42  ;;  %v2106_v4 = vmax.f32 %v786_v43, 0.0  ;;  %v1342_v6 = vpop.eup %1341  ;;  %v725_v42 = vld [vmem:[%s2402_s4 + $0x28] sm:$0xff] }
 0x1ce   :  { %v1084_v53 = vsel %vm1082_vm4, %v1083_v50, %v1081_v51  ;;  %440 = vst.msk [vmem:[#allocation3 + $0x70] sm:$0xff] %vm27_vm0, %v423_v61  ;;  %433 = vst.msk [vmem:[#allocation3 + $0x38] sm:$0xff] %vm27_vm0, %v416_v0  ;;  %v1139_v29 = vadd.f32 0.3, %v1123_v49  ;;  %v2111_v55 = vld [vmem:[#allocation2 + $0x60] sm:$0xff]  ;;  %v2113_v39 = vld [vmem:[#allocation2 + $0x28] sm:$0xff]  ;;  %v1086_v18 = vmul.f32 %v1342_v6, %v2011_v45 }
 0x1cf   :  { %v408_v38 = vpop.xlane.xlu0 %407  ;;  %v1130_v9 = vsub.f32 %v986_v59, %v1084_v53  ;;  %v947_v10 = vsel %vm945_vm5, %v946_v47, %v944_v44  ;;  %vm1087_vm8 = vcmp.eq.f32.partialorder %v2011_v45, inf  ;;  %1347 = vrsqrt.f32 %v2106_v4  ;;  %v756_v25 = vld [vmem:[#allocation3 + $0x20] sm:$0xff]  ;;  %v2131_v27 = vld [vmem:[#allocation2 + $0x68] sm:$0xff]  ;;  %v2170_v13 = vld [vmem:[%s2402_s4 + $0x30] sm:$0xff] }
 0x1d0   :  { %v424_v15 = vmin.f32 %v360_v36, %v408_v38  ;;  %v1344_v12 = vpop.eup %1343  ;;  %v1155_v14 = vmax.f32 %v1139_v29, 0.0  ;;  %v1090_v7 = vand.u32 2147483648, %v2011_v45  ;;  %v780_v19 = vmul.f32 2.0, %v2111_v55  ;;  %v764_v52 = vld [vmem:[#allocation3 + $0x60] sm:$0xff]  ;;  %v757_v30 = vld [vmem:[#allocation3 + $0x28] sm:$0xff] }
 0x1d1   :  { %v1146_v21 = vadd.f32 0.3, %v1130_v9  ;;  %vm843_vm6 = vcmp.gt.f32.partialorder %v1862_v5, -inf  ;;  %v1088_v1 = vsel %vm1087_vm8, %v2011_v45, %v1086_v18  ;;  %vm1089_vm7 = vcmp.eq.f32.partialorder %v2011_v45, 0.0  ;;  %v2151_v8 = vld [vmem:[#allocation2 + $0x30] sm:$0xff]  ;;  %v765_v34 = vld [vmem:[#allocation3 + $0x68] sm:$0xff] }
 0x1d2   :  { %441 = vst.msk [vmem:[#allocation3 + $0x78] sm:$0xff] %vm27_vm0, %v424_v15  ;;  %v773_v26 = vmul.f32 2.0, %v2113_v39  ;;  %v987_v63 = vsel %vm843_vm6, %v947_v10, -inf  ;;  %1171 = vst.msk [vmem:[%s2403_s6 + $0x18] sm:$0xff] %vm27_vm0, %v1155_v14  ;;  %v1091_v46 = vsel %vm1089_vm7, %v1090_v7, %v1088_v1  ;;  %v796_v3 = vadd.f32 %v780_v19, %v732_v56 }
 0x1d3   :  { %v1162_v28 = vmax.f32 %v1146_v21, 0.0  ;;  %v1131_v50 = vsub.f32 %v987_v63, %v1091_v46  ;;  %v804_v5 = vmul.f32 2.0, %v756_v25  ;;  %v781_v17 = vmul.f32 2.0, %v2131_v27  ;;  %v2202_v14 = vld [vmem:[#allocation2 + $0x38] sm:$0xff] }
 0x1d4   :  { %v789_v16 = vadd.f32 %v773_v26, %v725_v42  ;;  %v2141_v45 = vmax.f32 %v796_v3, 0.0  ;;  %v1023_v33 = vmul.f32 %v1344_v12, %v2009_v37  ;;  %v805_v36 = vmul.f32 2.0, %v757_v30  ;;  %v758_v19 = vld [vmem:[#allocation3 + $0x30] sm:$0xff]  ;;  %v2228_v46 = vld [vmem:[%s2402_s4 + $0x38] sm:$0xff] }
 0x1d5   :  { %1178 = vst.msk [vmem:[%s2403_s6 + $0x50] sm:$0xff] %vm27_vm0, %v1162_v28  ;;  %v1346_v54 = vpop.eup %1345  ;;  %v1147_v31 = vadd.f32 0.3, %v1131_v50  ;;  %v820_v2 = vadd.f32 %v804_v5, %v2004_v48  ;;  %v797_v62 = vadd.f32 %v781_v17, %v733_v60  ;;  %v812_v48 = vmul.f32 2.0, %v764_v52  ;;  %v2247_v52 = vld [vmem:[#allocation2 + $0x78] sm:$0xff] }
 0x1d6   :  { %v2144_v32 = vmax.f32 %v789_v16, 0.0  ;;  %1349 = vrsqrt.f32 %v2141_v45  ;;  %v893_v35 = vmul.f32 %v1346_v54, %v2045_v11  ;;  %v774_v38 = vmul.f32 2.0, %v2151_v8 }
 0x1d7   :  { %v1163_v23 = vmax.f32 %v1147_v31, 0.0  ;;  %v2155_v58 = vmax.f32 %v820_v2, 0.0  ;;  %v813_v20 = vmul.f32 2.0, %v765_v34  ;;  %vm836_vm9 = vcmp.gt.f32.partialorder %v1972_v22, -inf  ;;  %v2218_v22 = vld [vmem:[%s2402_s4 + $0x70] sm:$0xff] }
 0x1d8   :  { %1351 = vrsqrt.f32 %v2144_v32  ;;  %vm894_vm10 = vcmp.eq.f32.partialorder %v2045_v11, inf  ;;  %vm896_vm11 = vcmp.eq.f32.partialorder %v2045_v11, 0.0  ;;  %v897_v40 = vand.u32 2147483648, %v2045_v11 }
 0x1d9   :  { %1179 = vst.msk [vmem:[%s2403_s6 + $0x58] sm:$0xff] %vm27_vm0, %v1163_v23  ;;  %1353 = vrsqrt.f32 %v2155_v58  ;;  %v2173_v57 = vmax.f32 %v797_v62, 0.0  ;;  %v828_v41 = vadd.f32 %v812_v48, %v732_v56  ;;  %v821_v43 = vadd.f32 %v805_v36, %v725_v42  ;;  %v2197_v56 = vld [vmem:[#allocation2 + $0x70] sm:$0xff] }
 0x1da   :  { %v895_v0 = vsel %vm894_vm10, %v2045_v11, %v893_v35  ;;  %vm1024_vm14 = vcmp.eq.f32.partialorder %v2009_v37, inf  ;;  %v1027_v44 = vand.u32 2147483648, %v2009_v37  ;;  %v829_v49 = vadd.f32 %v813_v20, %v733_v60  ;;  %v766_v36 = vld [vmem:[#allocation3 + $0x70] sm:$0xff] }
 0x1db   :  { %v1025_v15 = vsel %vm1024_vm14, %v2009_v37, %v1023_v33  ;;  %1355 = vrsqrt.f32 %v2173_v57  ;;  %v790_v59 = vadd.f32 %v774_v38, %v2170_v13  ;;  %vm880_vm15 = vcmp.eq.f32.partialorder %v2106_v4, inf }
 0x1dc   :  { %v1348_v61 = vpop.eup %1347  ;;  %v883_v47 = vand.u32 2147483648, %v2106_v4  ;;  %v2184_v53 = vmax.f32 %v828_v41, 0.0  ;;  %v2186_v6 = vmax.f32 %v821_v43, 0.0  ;;  %v898_v29 = vsel %vm896_vm11, %v897_v40, %v895_v0  ;;  %v735_v41 = vld [vmem:[%s2402_s4 + $0x78] sm:$0xff] }
 0x1dd   :  { %v879_v51 = vmul.f32 %v1348_v61, %v2106_v4  ;;  %vm882_vm12 = vcmp.eq.f32.partialorder %v2106_v4, 0.0  ;;  %v2192_v10 = vmax.f32 %v829_v49, 0.0  ;;  %vm834_vm13 = vcmp.gt.f32.partialorder %v2068_v24, -inf }
 0x1de   :  { %vm1026_vm1 = vcmp.eq.f32.partialorder %v2009_v37, 0.0  ;;  %1357 = vrsqrt.f32 %v2184_v53  ;;  %v2200_v11 = vmax.f32 %v790_v59, 0.0  ;;  %vm950_vm2 = vcmp.eq.f32.partialorder %v2141_v45, inf  ;;  %v759_v59 = vld [vmem:[#allocation3 + $0x38] sm:$0xff] }
 0x1df   :  { %v881_v9 = vsel %vm880_vm15, %v2106_v4, %v879_v51  ;;  %v1028_v12 = vsel %vm1026_vm1, %v1027_v44, %v1025_v15  ;;  %1359 = vrsqrt.f32 %v2186_v6  ;;  %v2206_v4 = vsel %vm836_vm9, %v898_v29, -inf }
 0x1e0   :  { %v884_v18 = vsel %vm882_vm12, %v883_v47, %v881_v9  ;;  %vm952_vm3 = vcmp.eq.f32.partialorder %v2141_v45, 0.0  ;;  %v953_v21 = vand.u32 2147483648, %v2141_v45  ;;  %1361 = vrsqrt.f32 %v2192_v10 }
 0x1e1   :  { %v978_v42 = vsel %vm834_vm13, %v884_v18, -inf  ;;  %v782_v7 = vmul.f32 2.0, %v2197_v56  ;;  %vm901_vm4 = vcmp.eq.f32.partialorder %v2144_v32, inf  ;;  %vm903_vm5 = vcmp.eq.f32.partialorder %v2144_v32, 0.0 }
 0x1e2   :  { %v1122_v24 = vsub.f32 %v978_v42, %v1028_v12  ;;  %v775_v26 = vmul.f32 2.0, %v2202_v14  ;;  %v904_v28 = vand.u32 2147483648, %v2144_v32  ;;  %vm1038_vm8 = vcmp.eq.f32.partialorder %v2155_v58, inf }
 0x1e3   :  { %v1350_v37 = vpop.eup %1349  ;;  %1363 = vrsqrt.f32 %v2200_v11  ;;  %vm844_vm6 = vcmp.gt.f32.partialorder %v2111_v55, -inf  ;;  %vm1040_vm7 = vcmp.eq.f32.partialorder %v2155_v58, 0.0  ;;  %v806_v16 = vmul.f32 2.0, %v758_v19 }
 0x1e4   :  { %v1138_v1 = vadd.f32 0.3, %v1122_v24  ;;  %v949_v63 = vmul.f32 %v1350_v37, %v2141_v45  ;;  %vm837_vm9 = vcmp.gt.f32.partialorder %v2113_v39, -inf  ;;  %v1041_v17 = vand.u32 2147483648, %v2155_v58 }
 0x1e5   :  { %v1352_v25 = vpop.eup %1351  ;;  %vm957_vm10 = vcmp.eq.f32.partialorder %v2173_v57, inf  ;;  %v960_v54 = vand.u32 2147483648, %v2173_v57  ;;  %v798_v31 = vadd.f32 %v782_v7, %v2218_v22  ;;  %vm959_vm11 = vcmp.eq.f32.partialorder %v2173_v57, 0.0 }
 0x1e6   :  { %v1154_v3 = vmax.f32 %v1138_v1, 0.0  ;;  %v900_v50 = vmul.f32 %v1352_v25, %v2144_v32  ;;  %v1354_v5 = vpop.eup %1353  ;;  %vm1094_vm14 = vcmp.eq.f32.partialorder %v2184_v53, inf  ;;  %vm1096_vm15 = vcmp.eq.f32.partialorder %v2184_v53, 0.0 }
 0x1e7   :  { %v1037_v2 = vmul.f32 %v1354_v5, %v2155_v58  ;;  %v791_v60 = vadd.f32 %v775_v26, %v2228_v46  ;;  %v951_v30 = vsel %vm950_vm2, %v2141_v45, %v949_v63  ;;  %v1097_v34 = vand.u32 2147483648, %v2184_v53  ;;  %v767_v63 = vld [vmem:[#allocation3 + $0x78] sm:$0xff] }
 0x1e8   :  { %1170 = vst.msk [vmem:[%s2403_s6 + $0x10] sm:$0xff] %vm27_vm0, %v1154_v3  ;;  %vm1045_vm12 = vcmp.eq.f32.partialorder %v2186_v6, inf  ;;  %vm1047_vm13 = vcmp.eq.f32.partialorder %v2186_v6, 0.0  ;;  %v1356_v23 = vpop.eup %1355  ;;  %v902_v35 = vsel %vm901_vm4, %v2144_v32, %v900_v50  ;;  %v1048_v48 = vand.u32 2147483648, %v2186_v6 }
 0x1e9   :  { %v1039_v62 = vsel %vm1038_vm8, %v2155_v58, %v1037_v2  ;;  %v822_v33 = vadd.f32 %v806_v16, %v2170_v13  ;;  %vm845_vm1 = vcmp.gt.f32.partialorder %v2131_v27, -inf  ;;  %v956_v20 = vmul.f32 %v1356_v23, %v2173_v57 }
 0x1ea   :  { %v1042_v38 = vsel %vm1040_vm7, %v1041_v17, %v1039_v62  ;;  %v2267_v40 = vmax.f32 %v798_v31, 0.0  ;;  %v783_v43 = vmul.f32 2.0, %v2247_v52  ;;  %v954_v61 = vsel %vm952_vm3, %v953_v21, %v951_v30 }
 0x1eb   :  { %v1124_v13 = vsub.f32 %v2206_v4, %v1042_v38  ;;  %vm1101_vm2 = vcmp.eq.f32.partialorder %v2192_v10, inf  ;;  %v2277_v58 = vmax.f32 %v822_v33, 0.0  ;;  %v1358_v0 = vpop.eup %1357  ;;  %v905_v44 = vsel %vm903_vm5, %v904_v28, %v902_v35 }
 0x1ec   :  { %v958_v49 = vsel %vm957_vm10, %v2173_v57, %v956_v20  ;;  %v1104_v51 = vand.u32 2147483648, %v2192_v10  ;;  %v814_v15 = vmul.f32 2.0, %v766_v36  ;;  %v1360_v45 = vpop.eup %1359  ;;  %v1093_v29 = vmul.f32 %v1358_v0, %v2184_v53 }
 0x1ed   :  { %v1140_v47 = vadd.f32 0.3, %v1124_v13  ;;  %1365 = vrsqrt.f32 %v2277_v58  ;;  %v799_v9 = vadd.f32 %v783_v43, %v735_v41  ;;  %v988_v18 = vsel %vm844_vm6, %v954_v61, -inf  ;;  %v1362_v12 = vpop.eup %1361 }
 0x1ee   :  { %v1044_v32 = vmul.f32 %v1360_v45, %v2186_v6  ;;  %1367 = vrsqrt.f32 %v2267_v40  ;;  %v2291_v42 = vmax.f32 %v791_v60, 0.0  ;;  %v981_v4 = vsel %vm837_vm9, %v905_v44, -inf }
 0x1ef   :  { %v1156_v24 = vmax.f32 %v1140_v47, 0.0  ;;  %v1095_v37 = vsel %vm1094_vm14, %v2184_v53, %v1093_v29  ;;  %v807_v21 = vmul.f32 2.0, %v759_v59  ;;  %v961_v55 = vsel %vm959_vm11, %v960_v54, %v958_v49 }
 0x1f0   :  { %v1098_v7 = vsel %vm1096_vm15, %v1097_v34, %v1095_v37  ;;  %v1046_v19 = vsel %vm1045_vm12, %v2186_v6, %v1044_v32  ;;  %v1100_v25 = vmul.f32 %v1362_v12, %v2192_v10  ;;  %v1364_v39 = vpop.eup %1363  ;;  %v2312_v26 = vmax.f32 %v799_v9, 0.0 }
 0x1f1   :  { %1172 = vst.msk [vmem:[%s2403_s6 + $0x20] sm:$0xff] %vm27_vm0, %v1156_v24  ;;  %v1132_v1 = vsub.f32 %v988_v18, %v1098_v7  ;;  %v1049_v57 = vsel %vm1047_vm13, %v1048_v48, %v1046_v19  ;;  %v830_v53 = vadd.f32 %v814_v15, %v2218_v22  ;;  %vm1103_vm3 = vcmp.eq.f32.partialorder %v2192_v10, 0.0 }
 0x1f2   :  { %v1125_v28 = vsub.f32 %v981_v4, %v1049_v57  ;;  %v1102_v3 = vsel %vm1101_vm2, %v2192_v10, %v1100_v25  ;;  %1369 = vrsqrt.f32 %v2291_v42  ;;  %v989_v50 = vsel %vm845_vm1, %v961_v55, -inf }
 0x1f3   :  { %v1148_v16 = vadd.f32 0.3, %v1132_v1  ;;  %v1105_v6 = vsel %vm1103_vm3, %v1104_v51, %v1102_v3  ;;  %v907_v17 = vmul.f32 %v1364_v39, %v2200_v11  ;;  %v815_v22 = vmul.f32 2.0, %v767_v63 }
 0x1f4   :  { %v1141_v5 = vadd.f32 0.3, %v1125_v28  ;;  %v1133_v54 = vsub.f32 %v989_v50, %v1105_v6  ;;  %1371 = vrsqrt.f32 %v2312_v26  ;;  %v1006_v2 = vmax.f32 %v830_v53, 0.0 }
 0x1f5   :  { %v1164_v31 = vmax.f32 %v1148_v16, 0.0  ;;  %v823_v60 = vadd.f32 %v807_v21, %v2228_v46  ;;  %vm908_vm4 = vcmp.eq.f32.partialorder %v2200_v11, inf  ;;  %v911_v46 = vand.u32 2147483648, %v2200_v11 }
 0x1f6   :  { %v1157_v30 = vmax.f32 %v1141_v5, 0.0  ;;  %v1149_v10 = vadd.f32 0.3, %v1133_v54  ;;  %1373 = vrsqrt.f32 %v1006_v2  ;;  %v909_v27 = vsel %vm908_vm4, %v2200_v11, %v907_v17 }
 0x1f7   :  { %1180 = vst.msk [vmem:[%s2403_s6 + $0x60] sm:$0xff] %vm27_vm0, %v1164_v31  ;;  %v2336_v23 = vmax.f32 %v823_v60, 0.0  ;;  %v831_v35 = vadd.f32 %v815_v22, %v735_v41  ;;  %vm910_vm5 = vcmp.eq.f32.partialorder %v2200_v11, 0.0  ;;  %vm1052_vm8 = vcmp.eq.f32.partialorder %v2277_v58, inf }
 0x1f8   :  { %1173 = vst.msk [vmem:[%s2403_s6 + $0x28] sm:$0xff] %vm27_vm0, %v1157_v30  ;;  %v1165_v34 = vmax.f32 %v1149_v10, 0.0  ;;  %v912_v33 = vsel %vm910_vm5, %v911_v46, %v909_v27  ;;  %v1055_v38 = vand.u32 2147483648, %v2277_v58  ;;  %vm838_vm6 = vcmp.gt.f32.partialorder %v2151_v8, -inf }
 0x1f9   :  { %1375 = vrsqrt.f32 %v2336_v23  ;;  %v2347_v20 = vmax.f32 %v831_v35, 0.0  ;;  %vm1054_vm7 = vcmp.eq.f32.partialorder %v2277_v58, 0.0  ;;  %v982_v41 = vsel %vm838_vm6, %v912_v33, -inf }
 0x1fa   :  { %v1366_v62 = vpop.eup %1365  ;;  %1181 = vst.msk [vmem:[%s2403_s6 + $0x68] sm:$0xff] %vm27_vm0, %v1165_v34  ;;  %vm964_vm9 = vcmp.eq.f32.partialorder %v2267_v40, inf  ;;  %v967_v15 = vand.u32 2147483648, %v2267_v40  ;;  %vm966_vm10 = vcmp.eq.f32.partialorder %v2267_v40, 0.0  ;;  %vm915_vm11 = vcmp.eq.f32.partialorder %v2291_v42, inf }
 0x1fb   :  { %v1368_v48 = vpop.eup %1367  ;;  %v1051_v36 = vmul.f32 %v1366_v62, %v2277_v58  ;;  %1377 = vrsqrt.f32 %v2347_v20  ;;  %vm1108_vm14 = vcmp.eq.f32.partialorder %v1006_v2, inf  ;;  %v1111_v18 = vand.u32 2147483648, %v1006_v2 }
 0x1fc   :  { %v963_v43 = vmul.f32 %v1368_v48, %v2267_v40  ;;  %vm846_vm15 = vcmp.gt.f32.partialorder %v2197_v56, -inf  ;;  %v918_v32 = vand.u32 2147483648, %v2291_v42  ;;  %vm1110_vm12 = vcmp.eq.f32.partialorder %v1006_v2, 0.0 }
 0x1fd   :  { %v1053_v11 = vsel %vm1052_vm8, %v2277_v58, %v1051_v36  ;;  %vm917_vm13 = vcmp.eq.f32.partialorder %v2291_v42, 0.0  ;;  %vm971_vm1 = vcmp.eq.f32.partialorder %v2312_v26, inf  ;;  %vm839_vm2 = vcmp.gt.f32.partialorder %v2202_v14, -inf }
 0x1fe   :  { %v1056_v61 = vsel %vm1054_vm7, %v1055_v38, %v1053_v11  ;;  %v965_v51 = vsel %vm964_vm9, %v2267_v40, %v963_v43  ;;  %v974_v56 = vand.u32 2147483648, %v2312_v26  ;;  %vm1059_vm3 = vcmp.eq.f32.partialorder %v2336_v23, inf }
 0x1ff   :  { %v1370_v13 = vpop.eup %1369  ;;  %v1126_v0 = vsub.f32 %v982_v41, %v1056_v61  ;;  %v968_v45 = vsel %vm966_vm10, %v967_v15, %v965_v51  ;;  %v1062_v19 = vand.u32 2147483648, %v2336_v23  ;;  %vm973_vm4 = vcmp.eq.f32.partialorder %v2312_v26, 0.0 }
 0x200   :  { %v914_v8 = vmul.f32 %v1370_v13, %v2291_v42  ;;  %v990_v4 = vsel %vm846_vm15, %v968_v45, -inf  ;;  %vm1061_vm5 = vcmp.eq.f32.partialorder %v2336_v23, 0.0  ;;  %vm1115_vm8 = vcmp.eq.f32.partialorder %v2347_v20, inf }
 0x201   :  { %v1142_v44 = vadd.f32 0.3, %v1126_v0  ;;  %v1372_v49 = vpop.eup %1371  ;;  %v1118_v3 = vand.u32 2147483648, %v2347_v20  ;;  %vm847_vm6 = vcmp.gt.f32.partialorder %v2247_v52, -inf  ;;  %vm1117_vm7 = vcmp.eq.f32.partialorder %v2347_v20, 0.0 }
 0x202   :  { %v970_v47 = vmul.f32 %v1372_v49, %v2312_v26  ;;  %v916_v9 = vsel %vm915_vm11, %v2291_v42, %v914_v8 }
 0x203   :  { %v1158_v59 = vmax.f32 %v1142_v44, 0.0  ;;  %v1374_v58 = vpop.eup %1373  ;;  %v919_v37 = vsel %vm917_vm13, %v918_v32, %v916_v9 }
 0x204   :  { %v1107_v29 = vmul.f32 %v1374_v58, %v1006_v2  ;;  %v972_v21 = vsel %vm971_vm1, %v2312_v26, %v970_v47  ;;  %v983_v1 = vsel %vm839_vm2, %v919_v37, -inf }
 0x205   :  { %1174 = vst.msk [vmem:[%s2403_s6 + $0x30] sm:$0xff] %vm27_vm0, %v1158_v59  ;;  %v975_v57 = vsel %vm973_vm4, %v974_v56, %v972_v21 }
 0x206   :  { %v1109_v40 = vsel %vm1108_vm14, %v1006_v2, %v1107_v29  ;;  %v1376_v12 = vpop.eup %1375  ;;  %v991_v50 = vsel %vm847_vm6, %v975_v57, -inf }
 0x207   :  { %v1112_v24 = vsel %vm1110_vm12, %v1111_v18, %v1109_v40  ;;  %v1058_v7 = vmul.f32 %v1376_v12, %v2336_v23 }
 0x208   :  { %v1134_v55 = vsub.f32 %v990_v4, %v1112_v24  ;;  %v1378_v25 = vpop.eup %1377 }
 0x209   :  { %v1060_v39 = vsel %vm1059_vm3, %v2336_v23, %v1058_v7  ;;  %v1114_v63 = vmul.f32 %v1378_v25, %v2347_v20 }
 0x20a   :  { %v1150_v42 = vadd.f32 0.3, %v1134_v55  ;;  %v1063_v53 = vsel %vm1061_vm5, %v1062_v19, %v1060_v39 }
 0x20b   :  { %v1127_v28 = vsub.f32 %v983_v1, %v1063_v53  ;;  %v1116_v26 = vsel %vm1115_vm8, %v2347_v20, %v1114_v63 }
 0x20c   :  { %v1166_v14 = vmax.f32 %v1150_v42, 0.0  ;;  %v1119_v6 = vsel %vm1117_vm7, %v1118_v3, %v1116_v26 }
 0x20d   :  { %v1143_v16 = vadd.f32 0.3, %v1127_v28  ;;  %v1135_v5 = vsub.f32 %v991_v50, %v1119_v6 }
 0x20e   :  { %1182 = vst.msk [vmem:[%s2403_s6 + $0x70] sm:$0xff] %vm27_vm0, %v1166_v14 }
 0x20f   :  { %v1159_v17 = vmax.f32 %v1143_v16, 0.0  ;;  %v1151_v54 = vadd.f32 0.3, %v1135_v5 }
 0x211   :  { %1175 = vst.msk [vmem:[%s2403_s6 + $0x38] sm:$0xff] %vm27_vm0, %v1159_v17  ;;  %v1167_v52 = vmax.f32 %v1151_v54, 0.0 }
 0x213   :  { %1183 = vst.msk [vmem:[%s2403_s6 + $0x78] sm:$0xff] %vm27_vm0, %v1167_v52 }

</bundles_post_ra>
